<compile_context>
chip_gen: v5e
topology: v5e:2x2
jax: 0.10.0
libtpu: 0.0.40
codegen_flags: <defaults>
</compile_context>

<pallas_src>
import functools

import jax
import jax.numpy as jnp
from jax.experimental import pallas as pl
from jax.experimental.pallas import tpu as pltpu

_SQRT_2_OVER_PI = 0.7978845608028654


def _gelu(x):
    # GELU, tanh approximation (matches torch.nn.GELU(approximate='tanh')).
    return 0.5 * x * (1.0 + jnp.tanh(_SQRT_2_OVER_PI * (x + 0.044715 * x * x * x)))


def mbconv_kernel(x_ref, w1_ref, b1_ref, w2_ref, b2_ref, mdn_ref, mup_ref,
                  w3_ref, b3_ref, o_ref, *, ch):
    # x_ref: (B, H, W*Cin) lane-packed block (B images per grid step).
    B, H, WCin = x_ref.shape
    WCh = w1_ref.shape[1]
    WCout = w3_ref.shape[1]
    BH = B * H
    mxu_dtype = w1_ref.dtype            # bf16 weights -> bf16 MXU operands

    # Merge (B, H) -> rows; last (lane) dim untouched, so this reshape is free.
    xf = x_ref[...].reshape(BH, WCin)                               # (BH, W*Cin) f32

    # ---- conv1: 1x1 conv (+ fused BN) as block-diagonal matmul, then GELU ----
    # bf16 operands, f32 accumulation (MXU native); bias/GELU stay f32.
    h = jnp.dot(xf.astype(mxu_dtype), w1_ref[...],
                preferred_element_type=jnp.float32) + b1_ref[...]
    h = _gelu(h)                                                    # (BH, W*Ch) f32

    # ---- conv2: 3x3 depthwise conv (+ fused BN), pad=1, then GELU ------------
    w2 = w2_ref[...]                 # (9, W*Ch): single hoisted load, rows broadcast below
    mask_dn = mdn_ref[...]           # (BH, 1): 0 where source row y-1 crosses image top
    mask_up = mup_ref[...]           # (BH, 1): 0 where source row y+1 crosses image bottom

    # Column (dx) taps via circular lane rolls; left/right border wrap
    # contributions are already zeroed in the packed weights.
    t_m = pltpu.roll(h, shift=ch, axis=1)                           # reads column x-1
    t_p = pltpu.roll(h, shift=WCh - ch, axis=1)                     # reads column x+1

    # Row (dy) taps via sublane rolls + boundary masks, folding each dy-tap
    # into the accumulator as soon as it is formed (short live ranges, no
    # (BH,BH) shift matmuls).
    acc = t_m * w2[3:4, :] + h * w2[4:5, :] + t_p * w2[5:6, :]      # dy =  0
    s = t_m * w2[0:1, :] + h * w2[1:2, :] + t_p * w2[2:3, :]        # dy = -1 source
    acc = acc + pltpu.roll(s, shift=1, axis=0) * mask_dn            # out[y] += s[y-1]
    s = t_m * w2[6:7, :] + h * w2[7:8, :] + t_p * w2[8:9, :]        # dy = +1 source
    acc = acc + pltpu.roll(s, shift=BH - 1, axis=0) * mask_up       # out[y] += s[y+1]
    h2 = _gelu(acc + b2_ref[...])                                   # (BH, W*Ch) f32

    # ---- conv3: 1x1 conv (+ fused BN), residual add, GELU --------------------
    y = jnp.dot(h2.astype(mxu_dtype), w3_ref[...],
                preferred_element_type=jnp.float32) + b3_ref[...]
    y = _gelu(y + xf)                                               # shortcut (Cin == Cout)
    o_ref[...] = y.reshape(B, H, WCout).astype(o_ref.dtype)


def _default_images_per_step(n, h, max_rows=64):
    """Pick images-per-step B so that:
      * B*H <= max_rows -> depthwise temporaries stay register-resident
        (no vreg spills through the vld/vst slots), and
      * the grid has several steps -> BlockSpec pipelining has work to overlap
        and both v7x TensorCores are fed (B divides N, so odd N still works).
    """
    divs = [b for b in range(1, n + 1) if n % b == 0 and b * h <= max_rows]
    if not divs:
        return 1
    for min_steps in (4, 2, 1):
        cand = [b for b in divs if n // b >= min_steps]
        if cand:
            return max(cand)
    return 1


def pack_params(params, W, mxu_dtype=jnp.bfloat16):
    """Pack raw fused-conv params into the lane-dense layouts the kernel uses."""
    w1, b1, w2, b2, w3, b3 = params
    Cin, Ch = w1.shape
    dt = w1.dtype
    eye = jnp.eye(W, dtype=dt)
    # TODO(synk): kron(I_W, w) inflates weight bytes by W^2; fine at toy shapes,
    # switch to dense C-on-lanes matmuls for real TinyViT channel counts.
    w1_bd = jnp.kron(eye, w1).astype(mxu_dtype)     # (W*Cin, W*Ch) block-diagonal, bf16
    w3_bd = jnp.kron(eye, w3).astype(mxu_dtype)     # (W*Ch, W*Cout) block-diagonal, bf16
    b1t = jnp.tile(b1[None, :], (1, W))             # (1, W*Ch)  f32
    b2t = jnp.tile(b2[None, :], (1, W))             # (1, W*Ch)  f32
    b3t = jnp.tile(b3[None, :], (1, W))             # (1, W*Cout) f32
    w2t = jnp.tile(w2, (1, W))                      # (9, W*Ch), lane = w*Ch + c, f32
    # Fold the zero-padding of the left/right image border into the depthwise
    # weights: taps reading column x-1 (kx=0) contribute nothing at x==0, taps
    # reading x+1 (kx=2) contribute nothing at x==W-1.  Zeroing those lanes
    # lets the kernel use plain circular lane rolls with no masks.
    xcol = jnp.arange(W * Ch) // Ch                 # pixel column per lane
    kx = jnp.arange(9) % 3                          # tap column index per w2 row
    keep = ~(((kx[:, None] == 0) & (xcol[None, :] == 0)) |
             ((kx[:, None] == 2) & (xcol[None, :] == W - 1)))
    w2t = w2t * keep.astype(dt)
    return w1_bd, b1t, w2t, b2t, w3_bd, b3t


def mbconv(x_nhwc, packed_params, *, images_per_step=None):
    """x_nhwc: (N, H, W, Cin) float32. Returns (N, H, W, Cout)."""
    w1_bd, b1t, w2t, b2t, w3_bd, b3t = packed_params
    N, H, W, Cin = x_nhwc.shape
    WCin = W * Cin
    WCh = w1_bd.shape[1]
    WCout = w3_bd.shape[1]
    Ch = WCh // W
    Cout = WCout // W
    assert Cin == Cout, "MBConv residual requires in_chans == out_chans"

    if images_per_step is None:
        images_per_step = _default_images_per_step(N, H)
    B = images_per_step
    assert N % B == 0, "batch must be divisible by images_per_step"
    BH = B * H

    # Lane-packed input: lane index = w*Cin + c (row-major reshape, free).
    x_packed = x_nhwc.reshape(N, H, WCin)

    # (BH,1) 0/1 row-boundary masks for the dy = -1 / +1 depthwise taps
    # (replace the old dense (BH,BH) shift matrices + MXU matmuls).
    row = jnp.arange(BH) % H
    mask_dn = (row != 0).astype(x_nhwc.dtype).reshape(BH, 1)
    mask_up = (row != H - 1).astype(x_nhwc.dtype).reshape(BH, 1)

    kernel = functools.partial(mbconv_kernel, ch=Ch)
    out = pl.pallas_call(
        kernel,
        out_shape=jax.ShapeDtypeStruct((N, H, WCout), x_nhwc.dtype),
        grid_spec=pltpu.PrefetchScalarGridSpec(
            num_scalar_prefetch=0,
            grid=(N // B,),
            in_specs=[
                pl.BlockSpec((B, H, WCin), lambda n: (n, 0, 0)),    # x (lane-packed)
                pl.BlockSpec((WCin, WCh), lambda n: (0, 0)),        # w1 block-diag (bf16)
                pl.BlockSpec((1, WCh), lambda n: (0, 0)),           # b1 (tiled, f32)
                pl.BlockSpec((9, WCh), lambda n: (0, 0)),           # w2 (tiled, border-folded)
                pl.BlockSpec((1, WCh), lambda n: (0, 0)),           # b2 (tiled, f32)
                pl.BlockSpec((BH, 1), lambda n: (0, 0)),            # row mask dy=-1
                pl.BlockSpec((BH, 1), lambda n: (0, 0)),            # row mask dy=+1
                pl.BlockSpec((WCh, WCout), lambda n: (0, 0)),       # w3 block-diag (bf16)
                pl.BlockSpec((1, WCout), lambda n: (0, 0)),         # b3 (tiled, f32)
            ],
            out_specs=pl.BlockSpec((B, H, WCout), lambda n: (n, 0, 0)),  # 128 lanes, dense
        ),
        compiler_params=pltpu.CompilerParams(
            dimension_semantics=("parallel",),
            # Footprint here is well under 1 MiB; 32 MiB is >= every generation's
            # scoped default and <= v7x's 64 MiB physical VMEM.
            vmem_limit_bytes=32 * 1024 * 1024),
    )(x_packed, w1_bd, b1t, w2t, b2t, mask_dn, mask_up, w3_bd, b3t)
    return out.reshape(N, H, W, Cout)


def init_params(key, in_chans, hidden, out_chans, eps=1e-5, dtype=jnp.float32):
    """Deterministic synthetic params; BN (inference mode) folded into convs."""
    ks = jax.random.split(key, 15)

    def bn_fold(kg, kb, km, kv, c):
        gamma = 1.0 + 0.1 * jax.random.normal(kg, (c,), dtype)
        beta = 0.1 * jax.random.normal(kb, (c,), dtype)
        mean = 0.1 * jax.random.normal(km, (c,), dtype)
        var = jax.random.uniform(kv, (c,), dtype, 0.5, 1.5)
        scale = gamma / jnp.sqrt(var + eps)
        shift = beta - mean * scale
        return scale, shift

    # conv1: torch Conv2d(in_chans, hidden, 1), weight (hidden, in_chans, 1, 1)
    w1_t = 0.2 * jax.random.normal(ks[0], (hidden, in_chans), dtype)
    s1, sh1 = bn_fold(ks[1], ks[2], ks[3], ks[4], hidden)
    w1 = (w1_t * s1[:, None]).T                       # (in_chans, hidden)
    b1 = sh1

    # conv2: depthwise Conv2d(hidden, hidden, 3, pad=1, groups=hidden)
    w2_t = 0.2 * jax.random.normal(ks[5], (hidden, 3, 3), dtype)
    s2, sh2 = bn_fold(ks[6], ks[7], ks[8], ks[9], hidden)
    w2 = jnp.transpose(w2_t * s2[:, None, None], (1, 2, 0)).reshape(9, hidden)
    b2 = sh2

    # conv3: torch Conv2d(hidden, out_chans, 1), weight (out_chans, hidden, 1, 1).
    # (bn_weight_init=0.0 in the module; randomized here so the branch is non-trivial.)
    w3_t = 0.2 * jax.random.normal(ks[10], (out_chans, hidden), dtype)
    s3, sh3 = bn_fold(ks[11], ks[12], ks[13], ks[14], out_chans)
    w3 = (w3_t * s3[:, None]).T                       # (hidden, out_chans)
    b3 = sh3
    return w1, b1, w2, b2, w3, b3


def mbconv_ref(x_nhwc, params, mxu_dtype=jnp.float32):
    """Pure-JAX reference. mxu_dtype controls only the matmul operand dtype
    (accumulation stays f32), mirroring the kernel's MXU precision."""
    w1, b1, w2, b2, w3, b3 = params
    N, H, W, Cin = x_nhwc.shape
    Ch = w1.shape[1]
    h = _gelu(jnp.einsum('nhwc,cd->nhwd', x_nhwc.astype(mxu_dtype),
                         w1.astype(mxu_dtype),
                         preferred_element_type=jnp.float32) + b1)
    hp = jnp.pad(h, ((0, 0), (1, 1), (1, 1), (0, 0)))
    w2_33 = w2.reshape(3, 3, Ch)
    acc = jnp.zeros_like(h)
    for dy in range(3):
        for dx in range(3):
            acc = acc + hp[:, dy:dy + H, dx:dx + W, :] * w2_33[dy, dx]
    h2 = _gelu(acc + b2)
    y = jnp.einsum('nhwd,de->nhwe', h2.astype(mxu_dtype), w3.astype(mxu_dtype),
                   preferred_element_type=jnp.float32) + b3
    return _gelu(y + x_nhwc)


if __name__ == "__main__":
    # MBConv(in_chans=8, out_chans=8, expand_ratio=4, activation=GELU, drop_path=0.0)
    in_chans = 8
    expand_ratio = 4
    out_chans = 8
    hidden = int(in_chans * expand_ratio)   # 32
    N, H, W = 2, 16, 16

    key = jax.random.PRNGKey(0)
    kx, kp = jax.random.split(key)

    # PyTorch-layout input (NCHW), then transpose to the kernel's NHWC layout.
    x_nchw = jax.random.normal(kx, (N, in_chans, H, W), jnp.float32)
    x_nhwc = jnp.transpose(x_nchw, (0, 2, 3, 1))

    params = init_params(kp, in_chans, hidden, out_chans)
    packed = pack_params(params, W, mxu_dtype=jnp.bfloat16)

    out = mbconv(x_nhwc, packed)
    out = jax.block_until_ready(out)
    assert out.shape == (N, H, W, out_chans)

    # Matched-precision reference (same bf16 MXU operands, f32 accumulation):
    # should agree to f32 rounding noise.
    ref_bf16 = mbconv_ref(x_nhwc, params, mxu_dtype=jnp.bfloat16)
    err_bf16 = float(jnp.max(jnp.abs(out - ref_bf16)))
    assert err_bf16 < 1e-3, f"mismatch vs matched-precision reference: {err_bf16}"

    # Pure-f32 reference sanity bound: bf16-operand mixed precision drifts at
    # the ~1e-3 level for these magnitudes; anything larger signals a bug.
    ref_f32 = mbconv_ref(x_nhwc, params, mxu_dtype=jnp.float32)
    err_f32 = float(jnp.max(jnp.abs(out - ref_f32)))
    assert err_f32 < 5e-2, f"excessive drift vs pure-f32 reference: {err_f32}"

    print("KERNEL_OK")
</pallas_src>

<mosaic_0001>
module attributes {stable_mosaic.version = 11 : i64} {
  func.func @mbconv_kernel(%arg0: i32, %arg1: memref<1x16x128xf32, #tpu.memory_space<vmem>>, %arg2: memref<128x512xbf16, #tpu.memory_space<vmem>>, %arg3: memref<1x512xf32, #tpu.memory_space<vmem>>, %arg4: memref<9x512xf32, #tpu.memory_space<vmem>>, %arg5: memref<1x512xf32, #tpu.memory_space<vmem>>, %arg6: memref<16x1xf32, #tpu.memory_space<vmem>>, %arg7: memref<16x1xf32, #tpu.memory_space<vmem>>, %arg8: memref<512x128xbf16, #tpu.memory_space<vmem>>, %arg9: memref<1x128xf32, #tpu.memory_space<vmem>>, %arg10: memref<1x16x128xf32, #tpu.memory_space<vmem>>) attributes {dimension_semantics = [#tpu.dimension_semantics<parallel>], iteration_bounds = array<i64: 2>, scalar_prefetch = 0 : i64, scratch_operands = 0 : i64, tpu.core_type = #tpu.core_type<tc>, window_params = [{transform_indices = @transform_0, window_bounds = array<i64: 1, 16, 128>}, {pipeline_mode = #tpu.pipeline_mode<synchronous>, transform_indices = @transform_1, window_bounds = array<i64: 128, 512>}, {pipeline_mode = #tpu.pipeline_mode<synchronous>, transform_indices = @transform_2, window_bounds = array<i64: 1, 512>}, {pipeline_mode = #tpu.pipeline_mode<synchronous>, transform_indices = @transform_3, window_bounds = array<i64: 9, 512>}, {pipeline_mode = #tpu.pipeline_mode<synchronous>, transform_indices = @transform_4, window_bounds = array<i64: 1, 512>}, {pipeline_mode = #tpu.pipeline_mode<synchronous>, transform_indices = @transform_5, window_bounds = array<i64: 16, 1>}, {pipeline_mode = #tpu.pipeline_mode<synchronous>, transform_indices = @transform_6, window_bounds = array<i64: 16, 1>}, {pipeline_mode = #tpu.pipeline_mode<synchronous>, transform_indices = @transform_7, window_bounds = array<i64: 512, 128>}, {pipeline_mode = #tpu.pipeline_mode<synchronous>, transform_indices = @transform_8, window_bounds = array<i64: 1, 128>}, {transform_indices = @transform_9, window_bounds = array<i64: 1, 16, 128>}]} {
    %c0 = arith.constant 0 : index
    %c0_0 = arith.constant 0 : index
    %c0_1 = arith.constant 0 : index
    %0 = vector.load %arg1[%c0, %c0_0, %c0_1] : memref<1x16x128xf32, #tpu.memory_space<vmem>>, vector<1x16x128xf32>
    %1 = vector.shape_cast %0 : vector<1x16x128xf32> to vector<16x128xf32>
    %2 = arith.truncf %1 : vector<16x128xf32> to vector<16x128xbf16>
    %c0_2 = arith.constant 0 : index
    %c0_3 = arith.constant 0 : index
    %3 = vector.load %arg2[%c0_2, %c0_3] : memref<128x512xbf16, #tpu.memory_space<vmem>>, vector<128x512xbf16>
    %cst = arith.constant dense<0.000000e+00> : vector<16x512xf32>
    %4 = tpu.matmul %2, %3, %cst {dimension_numbers = #tpu.dot_dimension_numbers<[1], [0], [0], [1], [0, 0, 1, 1], [], []>} : vector<16x128xbf16>, vector<128x512xbf16>, vector<16x512xf32> -> vector<16x512xf32>
    %c0_4 = arith.constant 0 : index
    %c0_5 = arith.constant 0 : index
    %5 = vector.load %arg3[%c0_4, %c0_5] : memref<1x512xf32, #tpu.memory_space<vmem>>, vector<1x512xf32>
    %6 = vector.broadcast %5 : vector<1x512xf32> to vector<16x512xf32>
    %7 = arith.addf %4, %6 : vector<16x512xf32>
    %cst_6 = arith.constant 5.000000e-01 : f32
    %8 = vector.broadcast %cst_6 : f32 to vector<16x512xf32>
    %9 = arith.mulf %8, %7 : vector<16x512xf32>
    %cst_7 = arith.constant 4.471500e-02 : f32
    %10 = vector.broadcast %cst_7 : f32 to vector<16x512xf32>
    %11 = arith.mulf %10, %7 : vector<16x512xf32>
    %12 = arith.mulf %11, %7 : vector<16x512xf32>
    %13 = arith.mulf %12, %7 : vector<16x512xf32>
    %14 = arith.addf %7, %13 : vector<16x512xf32>
    %cst_8 = arith.constant 0.797884583 : f32
    %15 = vector.broadcast %cst_8 : f32 to vector<16x512xf32>
    %16 = arith.mulf %15, %14 : vector<16x512xf32>
    %17 = math.tanh %16 : vector<16x512xf32>
    %cst_9 = arith.constant 1.000000e+00 : f32
    %18 = vector.broadcast %cst_9 : f32 to vector<16x512xf32>
    %19 = arith.addf %18, %17 : vector<16x512xf32>
    %20 = arith.mulf %9, %19 : vector<16x512xf32>
    %c0_10 = arith.constant 0 : index
    %c0_11 = arith.constant 0 : index
    %21 = vector.load %arg4[%c0_10, %c0_11] : memref<9x512xf32, #tpu.memory_space<vmem>>, vector<9x512xf32>
    %c0_12 = arith.constant 0 : index
    %c0_13 = arith.constant 0 : index
    %22 = vector.load %arg6[%c0_12, %c0_13] : memref<16x1xf32, #tpu.memory_space<vmem>>, vector<16x1xf32>
    %c0_14 = arith.constant 0 : index
    %c0_15 = arith.constant 0 : index
    %23 = vector.load %arg7[%c0_14, %c0_15] : memref<16x1xf32, #tpu.memory_space<vmem>>, vector<16x1xf32>
    %c32_i32 = arith.constant 32 : i32
    %24 = tpu.dynamic_rotate %20 by %c32_i32 dim 1 : vector<16x512xf32>, i32 -> vector<16x512xf32>
    %c480_i32 = arith.constant 480 : i32
    %25 = tpu.dynamic_rotate %20 by %c480_i32 dim 1 : vector<16x512xf32>, i32 -> vector<16x512xf32>
    %26 = vector.extract_strided_slice %21 {offsets = [3, 0], sizes = [1, 512], strides = [1, 1]} : vector<9x512xf32> to vector<1x512xf32>
    %27 = vector.broadcast %26 : vector<1x512xf32> to vector<16x512xf32>
    %28 = arith.mulf %24, %27 : vector<16x512xf32>
    %29 = vector.extract_strided_slice %21 {offsets = [4, 0], sizes = [1, 512], strides = [1, 1]} : vector<9x512xf32> to vector<1x512xf32>
    %30 = vector.broadcast %29 : vector<1x512xf32> to vector<16x512xf32>
    %31 = arith.mulf %20, %30 : vector<16x512xf32>
    %32 = arith.addf %28, %31 : vector<16x512xf32>
    %33 = vector.extract_strided_slice %21 {offsets = [5, 0], sizes = [1, 512], strides = [1, 1]} : vector<9x512xf32> to vector<1x512xf32>
    %34 = vector.broadcast %33 : vector<1x512xf32> to vector<16x512xf32>
    %35 = arith.mulf %25, %34 : vector<16x512xf32>
    %36 = arith.addf %32, %35 : vector<16x512xf32>
    %37 = vector.extract_strided_slice %21 {offsets = [0, 0], sizes = [1, 512], strides = [1, 1]} : vector<9x512xf32> to vector<1x512xf32>
    %38 = vector.broadcast %37 : vector<1x512xf32> to vector<16x512xf32>
    %39 = arith.mulf %24, %38 : vector<16x512xf32>
    %40 = vector.extract_strided_slice %21 {offsets = [1, 0], sizes = [1, 512], strides = [1, 1]} : vector<9x512xf32> to vector<1x512xf32>
    %41 = vector.broadcast %40 : vector<1x512xf32> to vector<16x512xf32>
    %42 = arith.mulf %20, %41 : vector<16x512xf32>
    %43 = arith.addf %39, %42 : vector<16x512xf32>
    %44 = vector.extract_strided_slice %21 {offsets = [2, 0], sizes = [1, 512], strides = [1, 1]} : vector<9x512xf32> to vector<1x512xf32>
    %45 = vector.broadcast %44 : vector<1x512xf32> to vector<16x512xf32>
    %46 = arith.mulf %25, %45 : vector<16x512xf32>
    %47 = arith.addf %43, %46 : vector<16x512xf32>
    %c1_i32 = arith.constant 1 : i32
    %48 = tpu.dynamic_rotate %47 by %c1_i32 dim 0 : vector<16x512xf32>, i32 -> vector<16x512xf32>
    %49 = vector.broadcast %22 : vector<16x1xf32> to vector<16x512xf32>
    %50 = arith.mulf %48, %49 : vector<16x512xf32>
    %51 = arith.addf %36, %50 : vector<16x512xf32>
    %52 = vector.extract_strided_slice %21 {offsets = [6, 0], sizes = [1, 512], strides = [1, 1]} : vector<9x512xf32> to vector<1x512xf32>
    %53 = vector.broadcast %52 : vector<1x512xf32> to vector<16x512xf32>
    %54 = arith.mulf %24, %53 : vector<16x512xf32>
    %55 = vector.extract_strided_slice %21 {offsets = [7, 0], sizes = [1, 512], strides = [1, 1]} : vector<9x512xf32> to vector<1x512xf32>
    %56 = vector.broadcast %55 : vector<1x512xf32> to vector<16x512xf32>
    %57 = arith.mulf %20, %56 : vector<16x512xf32>
    %58 = arith.addf %54, %57 : vector<16x512xf32>
    %59 = vector.extract_strided_slice %21 {offsets = [8, 0], sizes = [1, 512], strides = [1, 1]} : vector<9x512xf32> to vector<1x512xf32>
    %60 = vector.broadcast %59 : vector<1x512xf32> to vector<16x512xf32>
    %61 = arith.mulf %25, %60 : vector<16x512xf32>
    %62 = arith.addf %58, %61 : vector<16x512xf32>
    %c15_i32 = arith.constant 15 : i32
    %63 = tpu.dynamic_rotate %62 by %c15_i32 dim 0 : vector<16x512xf32>, i32 -> vector<16x512xf32>
    %64 = vector.broadcast %23 : vector<16x1xf32> to vector<16x512xf32>
    %65 = arith.mulf %63, %64 : vector<16x512xf32>
    %66 = arith.addf %51, %65 : vector<16x512xf32>
    %c0_16 = arith.constant 0 : index
    %c0_17 = arith.constant 0 : index
    %67 = vector.load %arg5[%c0_16, %c0_17] : memref<1x512xf32, #tpu.memory_space<vmem>>, vector<1x512xf32>
    %68 = vector.broadcast %67 : vector<1x512xf32> to vector<16x512xf32>
    %69 = arith.addf %66, %68 : vector<16x512xf32>
    %cst_18 = arith.constant 5.000000e-01 : f32
    %70 = vector.broadcast %cst_18 : f32 to vector<16x512xf32>
    %71 = arith.mulf %70, %69 : vector<16x512xf32>
    %cst_19 = arith.constant 4.471500e-02 : f32
    %72 = vector.broadcast %cst_19 : f32 to vector<16x512xf32>
    %73 = arith.mulf %72, %69 : vector<16x512xf32>
    %74 = arith.mulf %73, %69 : vector<16x512xf32>
    %75 = arith.mulf %74, %69 : vector<16x512xf32>
    %76 = arith.addf %69, %75 : vector<16x512xf32>
    %cst_20 = arith.constant 0.797884583 : f32
    %77 = vector.broadcast %cst_20 : f32 to vector<16x512xf32>
    %78 = arith.mulf %77, %76 : vector<16x512xf32>
    %79 = math.tanh %78 : vector<16x512xf32>
    %cst_21 = arith.constant 1.000000e+00 : f32
    %80 = vector.broadcast %cst_21 : f32 to vector<16x512xf32>
    %81 = arith.addf %80, %79 : vector<16x512xf32>
    %82 = arith.mulf %71, %81 : vector<16x512xf32>
    %83 = arith.truncf %82 : vector<16x512xf32> to vector<16x512xbf16>
    %c0_22 = arith.constant 0 : index
    %c0_23 = arith.constant 0 : index
    %84 = vector.load %arg8[%c0_22, %c0_23] : memref<512x128xbf16, #tpu.memory_space<vmem>>, vector<512x128xbf16>
    %cst_24 = arith.constant dense<0.000000e+00> : vector<16x128xf32>
    %85 = tpu.matmul %83, %84, %cst_24 {dimension_numbers = #tpu.dot_dimension_numbers<[1], [0], [0], [1], [0, 0, 1, 1], [], []>} : vector<16x512xbf16>, vector<512x128xbf16>, vector<16x128xf32> -> vector<16x128xf32>
    %c0_25 = arith.constant 0 : index
    %c0_26 = arith.constant 0 : index
    %86 = vector.load %arg9[%c0_25, %c0_26] : memref<1x128xf32, #tpu.memory_space<vmem>>, vector<1x128xf32>
    %87 = vector.broadcast %86 : vector<1x128xf32> to vector<16x128xf32>
    %88 = arith.addf %85, %87 : vector<16x128xf32>
    %89 = arith.addf %88, %1 : vector<16x128xf32>
    %cst_27 = arith.constant 5.000000e-01 : f32
    %90 = vector.broadcast %cst_27 : f32 to vector<16x128xf32>
    %91 = arith.mulf %90, %89 : vector<16x128xf32>
    %cst_28 = arith.constant 4.471500e-02 : f32
    %92 = vector.broadcast %cst_28 : f32 to vector<16x128xf32>
    %93 = arith.mulf %92, %89 : vector<16x128xf32>
    %94 = arith.mulf %93, %89 : vector<16x128xf32>
    %95 = arith.mulf %94, %89 : vector<16x128xf32>
    %96 = arith.addf %89, %95 : vector<16x128xf32>
    %cst_29 = arith.constant 0.797884583 : f32
    %97 = vector.broadcast %cst_29 : f32 to vector<16x128xf32>
    %98 = arith.mulf %97, %96 : vector<16x128xf32>
    %99 = math.tanh %98 : vector<16x128xf32>
    %cst_30 = arith.constant 1.000000e+00 : f32
    %100 = vector.broadcast %cst_30 : f32 to vector<16x128xf32>
    %101 = arith.addf %100, %99 : vector<16x128xf32>
    %102 = arith.mulf %91, %101 : vector<16x128xf32>
    %103 = vector.shape_cast %102 : vector<16x128xf32> to vector<1x16x128xf32>
    %c0_31 = arith.constant 0 : index
    %c0_32 = arith.constant 0 : index
    %c0_33 = arith.constant 0 : index
    %104 = vector.load %arg10[%c0_31, %c0_32, %c0_33] : memref<1x16x128xf32, #tpu.memory_space<vmem>>, vector<1x16x128xf32>
    tpu.vector_store %arg10[%c0_31, %c0_32, %c0_33], %103 {strides = array<i32>} : memref<1x16x128xf32, #tpu.memory_space<vmem>>, vector<1x16x128xf32>,
    return
  }
  func.func @transform_0(%arg0: i32) -> (i32, i32, i32) {
    %c0_i32 = arith.constant 0 : i32
    %c0_i32_0 = arith.constant 0 : i32
    %c0_i32_1 = arith.constant 0 : i32
    return %arg0, %c0_i32, %c0_i32_0 : i32, i32, i32
  }
  func.func @transform_1(%arg0: i32) -> (i32, i32) {
    %c0_i32 = arith.constant 0 : i32
    %c0_i32_0 = arith.constant 0 : i32
    %c0_i32_1 = arith.constant 0 : i32
    return %c0_i32, %c0_i32_0 : i32, i32
  }
  func.func @transform_2(%arg0: i32) -> (i32, i32) {
    %c0_i32 = arith.constant 0 : i32
    %c0_i32_0 = arith.constant 0 : i32
    %c0_i32_1 = arith.constant 0 : i32
    return %c0_i32, %c0_i32_0 : i32, i32
  }
  func.func @transform_3(%arg0: i32) -> (i32, i32) {
    %c0_i32 = arith.constant 0 : i32
    %c0_i32_0 = arith.constant 0 : i32
    %c0_i32_1 = arith.constant 0 : i32
    return %c0_i32, %c0_i32_0 : i32, i32
  }
  func.func @transform_4(%arg0: i32) -> (i32, i32) {
    %c0_i32 = arith.constant 0 : i32
    %c0_i32_0 = arith.constant 0 : i32
    %c0_i32_1 = arith.constant 0 : i32
    return %c0_i32, %c0_i32_0 : i32, i32
  }
  func.func @transform_5(%arg0: i32) -> (i32, i32) {
    %c0_i32 = arith.constant 0 : i32
    %c0_i32_0 = arith.constant 0 : i32
    %c0_i32_1 = arith.constant 0 : i32
    return %c0_i32, %c0_i32_0 : i32, i32
  }
  func.func @transform_6(%arg0: i32) -> (i32, i32) {
    %c0_i32 = arith.constant 0 : i32
    %c0_i32_0 = arith.constant 0 : i32
    %c0_i32_1 = arith.constant 0 : i32
    return %c0_i32, %c0_i32_0 : i32, i32
  }
  func.func @transform_7(%arg0: i32) -> (i32, i32) {
    %c0_i32 = arith.constant 0 : i32
    %c0_i32_0 = arith.constant 0 : i32
    %c0_i32_1 = arith.constant 0 : i32
    return %c0_i32, %c0_i32_0 : i32, i32
  }
  func.func @transform_8(%arg0: i32) -> (i32, i32) {
    %c0_i32 = arith.constant 0 : i32
    %c0_i32_0 = arith.constant 0 : i32
    %c0_i32_1 = arith.constant 0 : i32
    return %c0_i32, %c0_i32_0 : i32, i32
  }
  func.func @transform_9(%arg0: i32) -> (i32, i32, i32) {
    %c0_i32 = arith.constant 0 : i32
    %c0_i32_0 = arith.constant 0 : i32
    %c0_i32_1 = arith.constant 0 : i32
    return %arg0, %c0_i32, %c0_i32_0 : i32, i32, i32
  }
}

</mosaic_0001>

<bundles_post_ra>
// kernel: tpu_custom_call.1
= control target key start
LH: loop header
LB: loop body
LE: loop exit
PB: predicated region body
PF: predicated region fallthrough
CT: control target
= control target key end

     0   :  { %s3124_s0 = inlined_call_operand.vmem [shape: f32[2,16,128], index: 0, kind: input, shape index: {}]   ;;  %s3125_s1 = inlined_call_operand.hbm [shape: bf16[128,512], index: 1, kind: input, shape index: {}]   ;;  %s3126_s2 = inlined_call_operand.hbm [shape: f32[1,512], index: 2, kind: input, shape index: {}]   ;;  %s3127_s3 = inlined_call_operand.hbm [shape: f32[9,512], index: 3, kind: input, shape index: {}]   ;;  %s3128_s4 = inlined_call_operand.hbm [shape: f32[1,512], index: 4, kind: input, shape index: {}]   ;;  %s3129_s5 = inlined_call_operand.vmem [shape: f32[16,1], index: 5, kind: input, shape index: {}]   ;;  %s3130_s6 = inlined_call_operand.vmem [shape: f32[16,1], index: 6, kind: input, shape index: {}]   ;;  %s3131_s7 = inlined_call_operand.hbm [shape: bf16[512,128], index: 7, kind: input, shape index: {}]   ;;  %s3132_s8 = inlined_call_operand.vmem [shape: f32[1,128], index: 8, kind: input, shape index: {}]   ;;  %s3133_s9 = inlined_call_operand.hbm [shape: f32[2,16,128], index: 9, kind: output, shape index: {}]  }
   0x1   :  { %3154 = sst [smem:[#allocation19_spill]] %s3125_s1 }
   0x2   :  { %3155 = sst [smem:[#allocation20_spill]] %s3126_s2 }
   0x3   :  { %3156 = sst [smem:[#allocation21_spill]] %s3128_s4 }
   0x4   :  { %14 = vsyncpa [#allocation3], 0 }
   0x5   :  { %15 = vsyncpa [#allocation6], 0 }
   0x6   :  { %16 = vsyncpa [#allocation9], 0 }
   0x7   :  { %17 = vsyncpa [#allocation4], 0 }
   0x8   :  { %19 = vsyncpa [#allocation4 + $0x1], 0  ;;  %s2394_s30 = smov 0   ;;  %s2396_s10 = smov 0  }
   0x9   :  { %s2398_s11 = smov 0   ;;  %s2400_s12 = smov 0  }
   0xa LB: > { %3157 = sst [smem:[#allocation16_spill]] %s2322_s11  ;;  %s2415_s13 = sadd.s32 4294967295, %s2326_s12   ;;  %s2326_s12 = sphi %s2400_s12, %s3198_s12   ;;  %s2322_s11 = sphi %s2398_s11, %s3203_s11   ;;  %s2318_s10 = sphi %s2396_s10, %s3202_s10   ;;  %s2314_s30 = sphi %s2394_s30, %s3201_s30  }
   0xb   : > { %s1611_s14 = sadd.s32 4294967294, %s2326_s12   ;;  %s2419_s15 = sadd.s32 1, %s2326_s12  }
   0xc   : > { %3158 = sst [smem:[#allocation17_spill]] %s2419_s15  ;;  %s226_s16 = sadd.s32 1, %s2322_s11 }
   0xd   : > { %s223_s17 = ssub.s32 %s2326_s12, %s2419_s15  ;;  %p236_p0 = scmp.ne.s32.totalorder %s2322_s11, %s2318_s10 }
   0xe   : > { %p224_p1 = scmp.eq.s32.totalorder %s223_s17, 0  ;;  %p237_p2 = scmp.eq.s32.totalorder %s2415_s13, 1 }
   0xf   : > { %p242_p3 = scmp.ne.s32.totalorder %s2318_s10, %s2314_s30  ;;  %p243_p4 = scmp.eq.s32.totalorder %s1611_s14, 1 }
  0x10   : > { %s2430_s18 = scalar_select %p224_p1, %s2322_s11, %s226_s16  }
  0x11   : > { %p2432_p5 = por %p237_p2, %p236_p0  ;;  %p2436_p6 = por %p243_p4, %p242_p3 }
  0x12   : > { %3159 = sst [smem:[#allocation18_spill]] %s2430_s18  ;;  %p1612_p7 = scmp.ge.s32.totalorder %s2326_s12, 1 }
  0x13   : > { %p250_p8 = scmp.lt.s32.totalorder %s2326_s12, 3  ;;  %p1997_p9 = scmp.eq.s32.totalorder %s2415_s13, 0 }
  0x14   : > { %s3163_s2 = sld [smem:[#allocation20_spill]]  ;;  %s2328_s25 = smov [#allocation5]  }
  0x15   : > { %p2443_p10 = pnand %p1612_p7, %p250_p8  ;;  %s278_s26 = sshll.u32 %s2328_s25, 4  ;;  %s279_s26 = int_to_ptr.vmem [resolvable:$true] %s278_s26 }
  0x16   : > { %s3164_s4 = sld [smem:[#allocation21_spill]]  ;;  %s2329_s23 = smov [#allocation8]  }
  0x17   : > { %p1977_p11 = pneg %p2443_p10  ;;  %s3166_s1 = sld [smem:[#allocation19_spill]] }
  0x18   : > { %s304_s25 = sshll.u32 %s2329_s23, 4  ;;  %s2330_s27 = smov [#allocation2]   ;;  %s305_s25 = int_to_ptr.vmem [resolvable:$true] %s304_s25 }
  0x19   : > { %p2457_p12 = pnand %p1997_p9, %p1977_p11  ;;  %s263_s28 = sshll.u32 %s2330_s27, 4  ;;  %s264_s28 = int_to_ptr.vmem [resolvable:$true] %s263_s28 }
  0x1a   : > { %s276_s24 = sshll.u32 %s3163_s2, 4  ;;  %s287_s18 = sshll.u32 %s3127_s3, 4  ;;  %s277_s24 = int_to_ptr.hbm [resolvable:$true] %s276_s24  ;;  %s288_s18 = int_to_ptr.hbm [resolvable:$true] %s287_s18 }
  0x1b   : > { %1983 = dma.hbm_to_vmem [thread:$0]  (!%p2457_p12), %s277_s24, 64, %s279_s26, [#allocation6]  }
  0x1c   : > { %s302_s29 = sshll.u32 %s3164_s4, 4  ;;  %s2331_s11 = smov 256   ;;  %s303_s29 = int_to_ptr.hbm [resolvable:$true] %s302_s29 }
  0x1d   : > { %s261_s22 = sshll.u32 %s3166_s1, 4  ;;  %s2332_s15 = smov 16   ;;  %s262_s22 = int_to_ptr.hbm [resolvable:$true] %s261_s22 }
  0x1e   : > { %1989 = dma.hbm_to_vmem [thread:$0]  (!%p2457_p12), %s303_s29, 64, %s305_s25, [#allocation9]  }
  0x1f   : > { %1980 = dma.hbm_to_vmem [thread:$0]  (!%p2457_p12), %s262_s22, 4096, %s264_s28, [#allocation3], %s2331_s11, %s2331_s11, %s2332_s15  }
  0x20   : > { %s2333_s16 = smov [#allocation7]   ;;  %s2334_s26 = smov 512  }
  0x21   : > { %s289_s24 = sshll.u32 %s2333_s16, 4  ;;  %s2335_s17 = smov 32   ;;  %s290_s24 = int_to_ptr.vmem [resolvable:$true] %s289_s24 }
  0x22   : > { %1986 = dma.hbm_to_vmem [thread:$0]  (!%p2457_p12), %s288_s18, 1024, %s290_s24, [#allocation6], %s2334_s26, %s2334_s26, %s2335_s17  }
  0x23   : > { %s319_s25 = sshll.u32 %s3131_s7, 4  ;;  %s2336_s2 = smov [#allocation10]   ;;  %s320_s25 = int_to_ptr.hbm [resolvable:$true] %s319_s25 }
  0x24   : > { %s321_s4 = sshll.u32 %s2336_s2, 4  ;;  %s2337_s27 = smov 64   ;;  %s322_s4 = int_to_ptr.vmem [resolvable:$true] %s321_s4 }
  0x25   : > { %s2338_s1 = smov 4   ;;  %348 = sbr.rel (%p2443_p10) target bundleno = 610 (0x262), region = 56 }
  0x26   : > { %1992 = dma.hbm_to_vmem [thread:$0]  (!%p2457_p12), %s320_s25, 4096, %s322_s4, [#allocation9], %s2337_s27, %s2337_s27, %s2338_s1  }
  0x2a   : > { %2297 = dma.done.wait (%p1997_p9), [#allocation3], 4096  }
  0x2b   : > { %2299 = vsyncadd (%p1997_p9), [#allocation3], 4294963200 }
  0x2c   : > { %2301 = dma.done.wait (%p1997_p9), [#allocation6], 1088  }
  0x2d   : > { %2303 = vsyncadd (%p1997_p9), [#allocation6], 4294966208 }
  0x2e   : > { %2305 = dma.done.wait (%p1997_p9), [#allocation9], 4160  }
  0x2f   : > { %2307 = vsyncadd (%p1997_p9), [#allocation9], 4294963136  ;;  %v1742_v0 = vld [vmem:[#allocation2 + $0xe0] sm:$0xf]  ;;  %v1920_v1 = vld [vmem:[#allocation2 + $0xec] sm:$0xf0] }
  0x30   : > { %v1918_v2 = vld [vmem:[#allocation2 + $0xe4] sm:$0xf]  ;;  %v1743_v3 = vor.u32 %v1920_v1, %v1742_v0  ;;  %v1744_v4 = vld [vmem:[#allocation2 + $0xf0] sm:$0xf0]  ;;  %v1750_v5 = vld [vmem:[#allocation2 + $0xe8] sm:$0xf] }
  0x31   : > { %v1921_v6 = vld [vmem:[#allocation2 + $0xf4] sm:$0xf0]  ;;  %v1747_v7 = vor.u32 %v1918_v2, %v1744_v4  ;;  %v1919_v9 = vld [vmem:[#allocation2 + $0xec] sm:$0xf]  ;;  %v1752_v10 = vld [vmem:[#allocation2 + $0xf8] sm:$0xf0] }
  0x32   : > { %v1751_v8 = vor.u32 %v1921_v6, %v1750_v5  ;;  %v1726_v11 = vld [vmem:[#allocation2 + $0xc0] sm:$0xf]  ;;  %615 = vmatpush.bf16.msra.mxu0 %v1743_v3  ;;  %v1755_v12 = vor.u32 %v1919_v9, %v1752_v10  ;;  %v1916_v13 = vld [vmem:[#allocation2 + $0xcc] sm:$0xf0]  ;;  %v1914_v14 = vld [vmem:[#allocation2 + $0xc4] sm:$0xf] }
  0x33   : > { %v1728_v15 = vld [vmem:[#allocation2 + $0xd0] sm:$0xf0]  ;;  %629 = vmatpush.bf16.msra.mxu1 %v1747_v7  ;;  %v1727_v16 = vor.u32 %v1916_v13, %v1726_v11  ;;  %v1734_v18 = vld [vmem:[#allocation2 + $0xc8] sm:$0xf]  ;;  %v1917_v19 = vld [vmem:[#allocation2 + $0xd4] sm:$0xf0] }
  0x34   : > { %643 = vmatpush.bf16.msra.mxu2 %v1751_v8  ;;  %v1731_v17 = vor.u32 %v1914_v14, %v1728_v15  ;;  %v1915_v20 = vld [vmem:[#allocation2 + $0xcc] sm:$0xf]  ;;  %657 = vmatpush.bf16.msra.mxu3 %v1755_v12  ;;  %v1735_v21 = vor.u32 %v1917_v19, %v1734_v18  ;;  %v1736_v22 = vld [vmem:[#allocation2 + $0xd8] sm:$0xf0]  ;;  %v1710_v23 = vld [vmem:[#allocation2 + $0xa0] sm:$0xf] }
  0x35   : > { %v1912_v24 = vld [vmem:[#allocation2 + $0xac] sm:$0xf0]  ;;  %v1739_v25 = vor.u32 %v1915_v20, %v1736_v22  ;;  %v1910_v26 = vld [vmem:[#allocation2 + $0xa4] sm:$0xf]  ;;  %v1712_v27 = vld [vmem:[#allocation2 + $0xb0] sm:$0xf0] }
  0x36   : > { %v1718_v28 = vld [vmem:[#allocation2 + $0xa8] sm:$0xf]  ;;  %616 = vmatpush.bf16.msra.mxu0 %v1727_v16  ;;  %v1711_v29 = vor.u32 %v1912_v24, %v1710_v23  ;;  %v1913_v30 = vld [vmem:[#allocation2 + $0xb4] sm:$0xf0]  ;;  %v1911_v31 = vld [vmem:[#allocation2 + $0xac] sm:$0xf]  ;;  %v1715_v33 = vor.u32 %v1910_v26, %v1712_v27 }
  0x37   : > { %v1720_v32 = vld [vmem:[#allocation2 + $0xb8] sm:$0xf0]  ;;  %630 = vmatpush.bf16.msra.mxu1 %v1731_v17  ;;  %v1719_v34 = vor.u32 %v1913_v30, %v1718_v28  ;;  %v1694_v35 = vld [vmem:[#allocation2 + $0x80] sm:$0xf]  ;;  %v1908_v36 = vld [vmem:[#allocation2 + $0x8c] sm:$0xf0] }
  0x38   : > { %644 = vmatpush.bf16.msra.mxu2 %v1735_v21  ;;  %v1906_v37 = vld [vmem:[#allocation2 + $0x84] sm:$0xf]  ;;  %658 = vmatpush.bf16.msra.mxu3 %v1739_v25  ;;  %v1723_v38 = vor.u32 %v1911_v31, %v1720_v32  ;;  %v1696_v39 = vld [vmem:[#allocation2 + $0x90] sm:$0xf0]  ;;  %v1702_v40 = vld [vmem:[#allocation2 + $0x88] sm:$0xf]  ;;  %v1695_v44 = vor.u32 %v1908_v36, %v1694_v35 }
  0x39   : > { %v1909_v41 = vld [vmem:[#allocation2 + $0x94] sm:$0xf0]  ;;  %v1907_v42 = vld [vmem:[#allocation2 + $0x8c] sm:$0xf]  ;;  %v1704_v43 = vld [vmem:[#allocation2 + $0x98] sm:$0xf0]  ;;  %v1699_v45 = vor.u32 %v1906_v37, %v1696_v39 }
  0x3a   : > { %617 = vmatpush.bf16.msra.mxu0 %v1711_v29  ;;  %p405_p13 = scmp.lt.s32.totalorder %s2415_s13, 1  ;;  %v1703_v46 = vor.u32 %v1909_v41, %v1702_v40  ;;  %v1678_v47 = vld [vmem:[#allocation2 + $0x60] sm:$0xf]  ;;  %v1904_v48 = vld [vmem:[#allocation2 + $0x6c] sm:$0xf0]  ;;  %v1707_v50 = vor.u32 %v1907_v42, %v1704_v43  ;;  %s2339_s14 = smov 32  }
  0x3b   : > { %631 = vmatpush.bf16.msra.mxu1 %v1715_v33  ;;  %v1902_v49 = vld [vmem:[#allocation2 + $0x64] sm:$0xf]  ;;  %v1680_v51 = vld [vmem:[#allocation2 + $0x70] sm:$0xf0]  ;;  %v1686_v52 = vld [vmem:[#allocation2 + $0x68] sm:$0xf]  ;;  %v1679_v56 = vor.u32 %v1904_v48, %v1678_v47 }
  0x3c   : > { %645 = vmatpush.bf16.msra.mxu2 %v1719_v34  ;;  %659 = vmatpush.bf16.msra.mxu3 %v1723_v38  ;;  %v1905_v53 = vld [vmem:[#allocation2 + $0x74] sm:$0xf0]  ;;  %v1903_v54 = vld [vmem:[#allocation2 + $0x6c] sm:$0xf]  ;;  %v1688_v55 = vld [vmem:[#allocation2 + $0x78] sm:$0xf0]  ;;  %v1683_v57 = vor.u32 %v1902_v49, %v1680_v51 }
  0x3d   : > { %s2498_s1 = scalar_select %p405_p13, %s2415_s13, 1  ;;  %v1687_v58 = vor.u32 %v1905_v53, %v1686_v52  ;;  %v1662_v59 = vld [vmem:[#allocation2 + $0x40] sm:$0xf]  ;;  %v1900_v60 = vld [vmem:[#allocation2 + $0x4c] sm:$0xf0]  ;;  %v1691_v62 = vor.u32 %v1903_v54, %v1688_v55 }
  0x3e   : > { %618 = vmatpush.bf16.msra.mxu0 %v1695_v44  ;;  %v1898_v61 = vld [vmem:[#allocation2 + $0x44] sm:$0xf]  ;;  %v1664_v63 = vld [vmem:[#allocation2 + $0x50] sm:$0xf0]  ;;  %v1670_v0 = vld [vmem:[#allocation2 + $0x48] sm:$0xf]  ;;  %v1663_v4 = vor.u32 %v1900_v60, %v1662_v59 }
  0x3f   : > { %632 = vmatpush.bf16.msra.mxu1 %v1699_v45  ;;  %v1901_v1 = vld [vmem:[#allocation2 + $0x54] sm:$0xf0]  ;;  %v1899_v2 = vld [vmem:[#allocation2 + $0x4c] sm:$0xf]  ;;  %v1672_v3 = vld [vmem:[#allocation2 + $0x58] sm:$0xf0]  ;;  %v1667_v6 = vor.u32 %v1898_v61, %v1664_v63 }
  0x40   : > { %646 = vmatpush.bf16.msra.mxu2 %v1703_v46  ;;  %660 = vmatpush.bf16.msra.mxu3 %v1707_v50  ;;  %v1646_v5 = vld [vmem:[#allocation2 + $0x20] sm:$0xf]  ;;  %s1889_s11 = sshll.u32 %s2498_s1, 4  ;;  %v1671_v7 = vor.u32 %v1901_v1, %v1670_v0  ;;  %v1896_v8 = vld [vmem:[#allocation2 + $0x2c] sm:$0xf0]  ;;  %v1675_v11 = vor.u32 %v1899_v2, %v1672_v3  ;;  %s2340_s22 = smov 96  }
  0x41   : > { %v1894_v9 = vld [vmem:[#allocation2 + $0x24] sm:$0xf]  ;;  %v1648_v10 = vld [vmem:[#allocation2 + $0x30] sm:$0xf0]  ;;  %v1654_v12 = vld [vmem:[#allocation2 + $0x28] sm:$0xf]  ;;  %v1647_v16 = vor.u32 %v1896_v8, %v1646_v5  ;;  %s2504_s21 = scalar_lea.vmem %s3124_s0, %s1889_s11 }
  0x42   : > { %619 = vmatpush.bf16.msra.mxu0 %v1679_v56  ;;  %v1897_v13 = vld [vmem:[#allocation2 + $0x34] sm:$0xf0]  ;;  %v1895_v14 = vld [vmem:[#allocation2 + $0x2c] sm:$0xf]  ;;  %v1656_v15 = vld [vmem:[#allocation2 + $0x38] sm:$0xf0]  ;;  %v1651_v18 = vor.u32 %v1894_v9, %v1648_v10 }
  0x43   : > { %633 = vmatpush.bf16.msra.mxu1 %v1683_v57  ;;  %v1630_v17 = vld [vmem:[#allocation2] sm:$0xf]  ;;  %v1655_v19 = vor.u32 %v1897_v13, %v1654_v12  ;;  %v1892_v20 = vld [vmem:[#allocation2 + $0xc] sm:$0xf0]  ;;  %v1890_v21 = vld [vmem:[#allocation2 + $0x4] sm:$0xf]  ;;  %v1659_v22 = vor.u32 %v1895_v14, %v1656_v15 }
  0x44   : > { %647 = vmatpush.bf16.msra.mxu2 %v1687_v58  ;;  %661 = vmatpush.bf16.msra.mxu3 %v1691_v62  ;;  %v1632_v23 = vld [vmem:[#allocation2 + $0x10] sm:$0xf0]  ;;  %v1638_v24 = vld [vmem:[#allocation2 + $0x8] sm:$0xf]  ;;  %v1893_v25 = vld [vmem:[#allocation2 + $0x14] sm:$0xf0]  ;;  %v1631_v28 = vor.u32 %v1892_v20, %v1630_v17 }
  0x45   : > { %v1891_v26 = vld [vmem:[#allocation2 + $0xc] sm:$0xf]  ;;  %v1640_v27 = vld [vmem:[#allocation2 + $0x18] sm:$0xf0]  ;;  %v410_v29 = vld [vmem:[%s2504_s21] sm:$0xff]  ;;  %v1635_v31 = vor.u32 %v1890_v21, %v1632_v23  ;;  %v1639_v32 = vor.u32 %v1893_v25, %v1638_v24  ;;  %s402_s27 = sand.u32 1, %s2318_s10  }
  0x46   : > { %620 = vmatpush.bf16.msra.mxu0 %v1663_v4  ;;  %v411_v30 = vld [vmem:[%s2504_s21 + $0x8] sm:$0xff]  ;;  %v1643_v33 = vor.u32 %v1891_v26, %v1640_v27  ;;  %v445_v35 = vld [vmem:[#allocation5] sm:$0xf]  ;;  %s1625_s1 = sshll.u32 %s402_s27, 4  ;;  %s1954_s11 = sshll.u32 %s2415_s13, 4 }
  0x47   : > { %634 = vmatpush.bf16.msra.mxu1 %v1667_v6  ;;  %v412_v34 = vpack.c.bf16 %v411_v30, %v410_v29  ;;  %v447_v36 = vperm.slane %v445_v35, 0  ;;  %v448_v37 = vperm.slane %v445_v35, 1  ;;  %v449_v44 = vperm.slane %v445_v35, 2  ;;  %s404_s15 = scalar_lea.vmem [#allocation11], %s1625_s1  ;;  %s1484_s16 = scalar_lea.sflag [#allocation4], %s402_s27 }
  0x48   : > { %648 = vmatpush.bf16.msra.mxu2 %v1671_v7  ;;  %662 = vmatpush.bf16.msra.mxu3 %v1675_v11  ;;  %v450_v46 = vperm.slane %v445_v35, 3  ;;  %s2272_s29 = scalar_lea.hbm %s3133_s9, 32 }
  0x4a   : > { %621 = vmatpush.bf16.msra.mxu0 %v1647_v16 }
  0x4b   : > { %635 = vmatpush.bf16.msra.mxu1 %v1651_v18 }
  0x4c   : > { %649 = vmatpush.bf16.msra.mxu2 %v1655_v19  ;;  %663 = vmatpush.bf16.msra.mxu3 %v1659_v22 }
  0x4e   : > { %622 = vmatpush.bf16.msra.mxu0 %v1631_v28 }
  0x4f   : > { %636 = vmatpush.bf16.msra.mxu1 %v1635_v31 }
  0x50   : > { %650 = vmatpush.bf16.msra.mxu2 %v1639_v32  ;;  %664 = vmatpush.bf16.msra.mxu3 %v1643_v33 }
  0x51   : > { %623 = vmatmul.bf16.vlgmr.msra.gmra.mxu0 %v412_v34 }
  0x52   : > { %637 = vmatmul.bf16.vlgmr.msra.gmra.mxu1 %v412_v34 }
  0x53   : > { %651 = vmatmul.bf16.vlgmr.msra.gmra.mxu2 %v412_v34  ;;  %665 = vmatmul.bf16.vlgmr.msra.gmra.mxu3 %v412_v34 }
  0xce   : > { %v624_v38 = vpop.f32.mrf.mxu0 }
  0xcf   : > { %v625_v39 = vadd.f32 %v624_v38, %v447_v36  ;;  %v638_v40 = vpop.f32.mrf.mxu1 }
  0xd0   : > { %v639_v41 = vadd.f32 %v638_v40, %v448_v37 }
  0xd1   : > { %v679_v42 = vmul.f32 0.044715, %v625_v39  ;;  %v671_v16 = vmul.f32 0.5, %v625_v39 }
  0xd2   : > { %v680_v43 = vmul.f32 0.044715, %v639_v41  ;;  %v672_v22 = vmul.f32 0.5, %v639_v41 }
  0xd3   : > { %v687_v45 = vmul.f32 %v679_v42, %v625_v39 }
  0xd4   : > { %v688_v47 = vmul.f32 %v680_v43, %v639_v41 }
  0xd5   : > { %v695_v48 = vmul.f32 %v687_v45, %v625_v39 }
  0xd6   : > { %v652_v49 = vpop.f32.mrf.mxu2  ;;  %v696_v50 = vmul.f32 %v688_v47, %v639_v41  ;;  %v666_v52 = vpop.f32.mrf.mxu3 }
  0xd7   : > { %v653_v51 = vadd.f32 %v652_v49, %v449_v44  ;;  %v626_v53 = vpop.f32.mrf.mxu0  ;;  %v703_v54 = vadd.f32 %v695_v48, %v625_v39  ;;  %v2508_v55 = vadd.f32 %v666_v52, %v450_v46  ;;  %v640_v57 = vpop.f32.mrf.mxu1 }
  0xd8   : > { %v2510_v56 = vadd.f32 %v626_v53, %v447_v36  ;;  %v704_v58 = vadd.f32 %v696_v50, %v639_v41  ;;  %v2512_v60 = vadd.f32 %v640_v57, %v448_v37 }
  0xd9   : > { %v681_v59 = vmul.f32 0.044715, %v653_v51  ;;  %v711_v61 = vmul.f32 0.7978846, %v703_v54  ;;  %v682_v62 = vmul.f32 0.044715, %v2508_v55 }
  0xda   : > { %v712_v63 = vmul.f32 0.7978846, %v704_v58  ;;  %v683_v1 = vmul.f32 0.044715, %v2510_v56  ;;  %v684_v4 = vmul.f32 0.044715, %v2512_v60 }
  0xdb   : > { %v689_v0 = vmul.f32 %v681_v59, %v653_v51  ;;  %2064 = vtanh.f32 %v711_v61  ;;  %v690_v2 = vmul.f32 %v682_v62, %v2508_v55  ;;  %v673_v33 = vmul.f32 0.5, %v653_v51 }
  0xdc   : > { %2066 = vtanh.f32 %v712_v63  ;;  %v691_v6 = vmul.f32 %v683_v1, %v2510_v56  ;;  %v692_v14 = vmul.f32 %v684_v4, %v2512_v60  ;;  %v674_v45 = vmul.f32 0.5, %v2508_v55  ;;  %v752_v1 = vld [vmem:[%s3129_s5 + $0x8] sm:$0xff] }
  0xdd   : > { %v697_v3 = vmul.f32 %v689_v0, %v653_v51  ;;  %v698_v5 = vmul.f32 %v690_v2, %v2508_v55  ;;  %v675_v52 = vmul.f32 0.5, %v2510_v56  ;;  %v676_v54 = vmul.f32 0.5, %v2512_v60  ;;  %v751_v2 = vld [vmem:[%s3129_s5] sm:$0xff]  ;;  %v754_v4 = vld [vmem:[%s3130_s6 + $0x8] sm:$0xff] }
  0xde   : > { %v654_v7 = vpop.f32.mrf.mxu2  ;;  %v668_v10 = vpop.f32.mrf.mxu3  ;;  %v699_v17 = vmul.f32 %v691_v6, %v2510_v56  ;;  %v700_v25 = vmul.f32 %v692_v14, %v2512_v60 }
  0xdf   : > { %v705_v8 = vadd.f32 %v697_v3, %v653_v51  ;;  %v2520_v9 = vadd.f32 %v654_v7, %v449_v44  ;;  %v706_v11 = vadd.f32 %v698_v5, %v2508_v55  ;;  %v2523_v12 = vadd.f32 %v668_v10, %v450_v46  ;;  %v753_v3 = vld [vmem:[%s3130_s6] sm:$0xff]  ;;  %v2611_v10 = vld [vmem:[#allocation7 + $0x10] sm:$0xff] }
  0xe0   : > { %v707_v28 = vadd.f32 %v699_v17, %v2510_v56  ;;  %v708_v32 = vadd.f32 %v700_v25, %v2512_v60  ;;  %v2341_v44 = vmov 0   ;;  %v771_v7 = vlaneseq }
  0xe1   : > { %v713_v13 = vmul.f32 0.7978846, %v705_v8  ;;  %v2065_v15 = vpop.eup %2064  ;;  %v714_v19 = vmul.f32 0.7978846, %v706_v11  ;;  %v685_v20 = vmul.f32 0.044715, %v2520_v9  ;;  %2056 = vset.pattern.permute.xlu1 %v2341_v44  ;;  %2058 = vset.pattern.permute.xlu0 %v2341_v44 }
  0xe2   : > { %v2067_v18 = vpop.eup %2066  ;;  %v727_v21 = vadd.f32 1.0, %v2065_v15  ;;  %v686_v23 = vmul.f32 0.044715, %v2523_v12  ;;  %v715_v35 = vmul.f32 0.7978846, %v707_v28  ;;  %2057 = vset.pattern.permute.xlu2 %v2341_v44  ;;  %v677_v62 = vmul.f32 0.5, %v2520_v9 }
  0xe3   : > { %2068 = vtanh.f32 %v713_v13  ;;  %v728_v24 = vadd.f32 1.0, %v2067_v18  ;;  %v693_v29 = vmul.f32 %v685_v20, %v2520_v9  ;;  %v716_v40 = vmul.f32 0.7978846, %v708_v32  ;;  %v2607_v8 = vld [vmem:[#allocation7] sm:$0xff] }
  0xe4   : > { %v2530_v26 = vmul.f32 %v727_v21, %v671_v16  ;;  %2070 = vtanh.f32 %v714_v19  ;;  %v694_v30 = vmul.f32 %v686_v23, %v2523_v12  ;;  %v678_v60 = vmul.f32 0.5, %v2523_v12 }
  0xe5   : > { %v2532_v27 = vmul.f32 %v728_v24, %v672_v22  ;;  %v701_v36 = vmul.f32 %v693_v29, %v2520_v9  ;;  %2072 = vtanh.f32 %v715_v35  ;;  %v819_v13 = vperm.slane %v2607_v8, 4 }
  0xe6   : > { %755 = vrot.lane.b32.xlu2 %v2530_v26, %s2339_s14  ;;  %v702_v37 = vmul.f32 %v694_v30, %v2523_v12  ;;  %2074 = vtanh.f32 %v716_v40  ;;  %v871_v14 = vperm.slane %v2607_v8, 1  ;;  %v2620_v15 = vand.u32 127, %v771_v7 }
  0xe7   : > { %759 = vrot.lane.b32.xlu0 %v2532_v27, %s2339_s14  ;;  %v709_v41 = vadd.f32 %v701_v36, %v2520_v9  ;;  %v2609_v9 = vld [vmem:[#allocation7 + $0x8] sm:$0xff]  ;;  %v968_v18 = vperm.slane %v2607_v8, 7  ;;  %v821_v20 = vperm.slane %v2611_v10, 4  ;;  %v873_v21 = vperm.slane %v2611_v10, 1 }
  0xe8   : > { %v710_v42 = vadd.f32 %v702_v37, %v2523_v12  ;;  %v2615_v12 = vld [vmem:[#allocation7 + $0x18] sm:$0xff]  ;;  %v820_v16 = vperm.slane %v2609_v9, 4  ;;  %v872_v17 = vperm.slane %v2609_v9, 1  ;;  %v969_v19 = vperm.slane %v2609_v9, 7 }
  0xe9   : > { %v2069_v31 = vpop.eup %2068  ;;  %v717_v46 = vmul.f32 0.7978846, %v709_v41  ;;  %vm773_vm0 = vcmp.lt.s32.totalorder %v2620_v15, 32  ;;  %v970_v22 = vperm.slane %v2611_v10, 7  ;;  %v822_v23 = vperm.slane %v2615_v12, 4 }
  0xea   : > { %v729_v34 = vadd.f32 1.0, %v2069_v31  ;;  %v2071_v39 = vpop.eup %2070  ;;  %v718_v47 = vmul.f32 0.7978846, %v710_v42  ;;  %v874_v24 = vperm.slane %v2615_v12, 1  ;;  %v971_v25 = vperm.slane %v2615_v12, 7 }
  0xeb   : > { %v730_v43 = vadd.f32 1.0, %v2071_v39  ;;  %v2073_v49 = vpop.eup %2072  ;;  %2076 = vtanh.f32 %v717_v46  ;;  %v2634_v28 = vmul.f32 %v819_v13, %v2530_v26  ;;  %v2637_v29 = vmul.f32 %v871_v14, %v2530_v26 }
  0xec   : > { %v2544_v38 = vmul.f32 %v729_v34, %v673_v33  ;;  %v2075_v50 = vpop.eup %2074  ;;  %2078 = vtanh.f32 %v718_v47  ;;  %v731_v51 = vadd.f32 1.0, %v2073_v49  ;;  %v3139_v30 = vperm.slane %v2609_v9, 0 }
  0xed   : > { %v2555_v48 = vmul.f32 %v730_v43, %v674_v45  ;;  %v732_v53 = vadd.f32 1.0, %v2075_v50  ;;  %v824_v31 = vmul.f32 %v820_v16, %v2532_v27  ;;  %v876_v32 = vmul.f32 %v872_v17, %v2532_v27 }
  0xee   : > { %763 = vrot.lane.b32.xlu1 %v2544_v38, %s2339_s14  ;;  %786 = vrot.lane.b32.xlu2 %v2532_v27, %s2340_s22  ;;  %v2565_v55 = vmul.f32 %v731_v51, %v675_v52  ;;  %v2643_v33 = vmul.f32 %v968_v18, %v2530_v26  ;;  %v3138_v34 = vperm.slane %v2609_v9, 6  ;;  %v973_v36 = vmul.f32 %v969_v19, %v2532_v27 }
  0xef   : > { %782 = vrot.lane.b32.xlu0 %v2530_v26, %s2340_s22  ;;  %v2569_v59 = vmul.f32 %v732_v53, %v676_v54  ;;  %v2652_v39 = vmul.f32 %v821_v20, %v2544_v38  ;;  %v2655_v41 = vmul.f32 %v873_v21, %v2544_v38  ;;  %v2658_v26 = vmul.f32 %v970_v22, %v2544_v38 }
  0xf0   : > { %v2661_v42 = vmul.f32 %v822_v23, %v2555_v48  ;;  %v2664_v43 = vmul.f32 %v874_v24, %v2555_v48  ;;  %v3141_v44 = vperm.slane %v2609_v9, 3  ;;  %v2670_v45 = vmul.f32 %v971_v25, %v2555_v48 }
  0xf1   : > { %v2077_v57 = vpop.eup %2076  ;;  %v2673_v46 = vmul.f32 %v819_v13, %v2565_v55  ;;  %v2676_v47 = vmul.f32 %v871_v14, %v2565_v55  ;;  %vm798_vm1 = vcmp.lt.s32.totalorder %v2620_v15, 96  ;;  %v2682_v49 = vmul.f32 %v820_v16, %v2569_v59 }
  0xf2   : > { %v2079_v58 = vpop.eup %2078  ;;  %v733_v61 = vadd.f32 1.0, %v2077_v57  ;;  %v2685_v50 = vmul.f32 %v968_v18, %v2565_v55  ;;  %v2690_v51 = vmul.f32 %v872_v17, %v2569_v59  ;;  %v2693_v52 = vmul.f32 %v969_v19, %v2569_v59 }
  0xf3   : > { %v734_v56 = vadd.f32 1.0, %v2079_v58  ;;  %v3137_v54 = vperm.slane %v2609_v9, 2  ;;  %v3149_v13 = vperm.slane %v2611_v10, 6  ;;  %v3153_v14 = vperm.slane %v2607_v8, 5 }
  0xf4   : > { %v2577_v63 = vmul.f32 %v733_v61, %v677_v62  ;;  %v2708_v61 = vld [vmem:[#allocation7 + $0x28] ss:$0 sm:$0xff]  ;;  %v3152_v16 = vperm.slane %v2607_v8, 2  ;;  %v3147_v19 = vperm.slane %v2611_v10, 2  ;;  %v3181_v15 = vperm.slane %v2609_v9, 5 }
  0xf5   : > { %v2579_v0 = vmul.f32 %v734_v56, %v678_v60 }
  0xf6   : > { %794 = vrot.lane.b32.xlu1 %v2555_v48, %s2340_s22  ;;  %790 = vrot.lane.b32.xlu2 %v2544_v38, %s2340_s22  ;;  %v2696_v53 = vmul.f32 %v821_v20, %v2577_v63  ;;  %v2700_v57 = vmul.f32 %v873_v21, %v2577_v63  ;;  %v3145_v20 = vperm.slane %v2607_v8, 3 }
  0xf7   : > { %767 = vrot.lane.b32.xlu0 %v2555_v48, %s2339_s14  ;;  %v2706_v58 = vmul.f32 %v822_v23, %v2579_v0  ;;  %v2716_v62 = vmul.f32 %v874_v24, %v2579_v0  ;;  %v2719_v60 = vmul.f32 %v971_v25, %v2579_v0  ;;  %v3143_v23 = vperm.slane %v2615_v12, 3 }
  0xf8   : > { %v3144_v24 = vperm.slane %v2607_v8, 0 }
  0xfe   : > { %784 = vrot.lane.b32.xlu1 %v2565_v55, %s2340_s22  ;;  %757 = vrot.lane.b32.xlu2 %v2565_v55, %s2339_s14  ;;  %v2703_v55 = vmul.f32 %v970_v22, %v2577_v63 }
  0xff   : > { %761 = vrot.lane.b32.xlu0 %v2569_v59, %s2339_s14 }
 0x106   : > { %765 = vrot.lane.b32.xlu1 %v2577_v63, %s2339_s14  ;;  %796 = vrot.lane.b32.xlu2 %v2579_v0, %s2340_s22 }
 0x107   : > { %792 = vrot.lane.b32.xlu0 %v2577_v63, %s2340_s22  ;;  %v3140_v63 = vperm.slane %v2609_v9, 5 }
 0x10e   : > { %769 = vrot.lane.b32.xlu1 %v2579_v0, %s2339_s14  ;;  %937 = vperm.xlu2 %2057, %v752_v1   ;;  %v841_v0 = vperm.slane %v2611_v10, 5  ;;  %s1495_s14 = scalar_lea.hbm %s3133_s9, %s1954_s11 }
 0x10f   : > { %788 = vrot.lane.b32.xlu0 %v2569_v59, %s2340_s22  ;;  %s1496_s22 = sshll.u32 %s404_s15, 4  ;;  %s1498_s28 = sshll.u32 %s1495_s14, 4  ;;  %s1497_s22 = int_to_ptr.vmem [resolvable:$true] %s1496_s22  ;;  %s1499_s28 = int_to_ptr.hbm [resolvable:$true] %s1498_s28 }
 0x110   : > { %s2266_s24 = sshra.s32 %s1499_s28, 4  ;;  %s2267_s24 = int_to_ptr.hbm [resolvable:$true] %s2266_s24 }
 0x111   : > { %s2268_s13 = scalar_lea.hbm %s2267_s24, 16  ;;  %p2273_p3 = scmp.lt.s32.totalorder %s2267_s24, %s3133_s9 }
 0x112   : > { %p2269_p0 = scmp.ne.s32.totalorder %s2267_s24, %s2268_s13  ;;  %p2274_p4 = scmp.lt.s32.totalorder %s2272_s29, %s2268_s13 }
 0x114   : > { %p2270_p1 = pnand %p2269_p0, %p2432_p5  ;;  %p2275_p7 = por %p2274_p4, %p2273_p3 }
 0x116   : > { %932 = vperm.xlu1 %2056, %v751_v2   ;;  %v3150_v2 = vperm.slane %v2611_v10, 3  ;;  %p2271_p2 = pneg %p2270_p1 }
 0x117   : > { %1027 = vperm.xlu0 %2058, %v753_v3   ;;  %v3142_v3 = vperm.slane %v2611_v10, 0 }
 0x118   : > { %p2276_p8 = pnand %p2275_p7, %p2271_p2 }
 0x11e   : > { %1032 = vperm.xlu1 %2056, %v754_v4  }
 0x140   : > { %v2603_v5 = vpop.permute.xlu2 %755 }
 0x148   : > { %v2605_v6 = vpop.permute.xlu2 %786 }
 0x150   : > { %v791_v40 = vpop.permute.xlu2 %790 }
 0x151   : > { %v801_v59 = vsel %vm798_vm1, %v2605_v6, %v791_v40 }
 0x152   : > { %v896_v18 = vmul.f32 %v3137_v54, %v801_v59  ;;  %v993_v21 = vmul.f32 %v2708_v61, %v801_v59 }
 0x159   : > { %v2613_v11 = vpop.permute.xlu0 %759 }
 0x15a   : > { %v778_v35 = vsel %vm773_vm0, %v2603_v5, %v2613_v11 }
 0x15b   : > { %v864_v38 = vmul.f32 %v3139_v30, %v778_v35  ;;  %v961_v48 = vmul.f32 %v3138_v34, %v778_v35  ;;  %v812_v56 = vmul.f32 %v3141_v44, %v778_v35  ;;  %v2737_v35 = vpop.permute.xlu2 %757  ;;  %v2755_v34 = vld [vmem:[#allocation7 + $0x30] ss:$0 sm:$0xff] }
 0x15d   : > { %v884_v1 = vadd.f32 %v876_v32, %v864_v38  ;;  %v981_v4 = vadd.f32 %v973_v36, %v961_v48  ;;  %v832_v22 = vadd.f32 %v824_v31, %v812_v56  ;;  %v3146_v38 = vperm.slane %v2615_v12, 0 }
 0x15e   : > { %v3148_v48 = vperm.slane %v2607_v8, 6  ;;  %v844_v31 = vmul.f32 %v3140_v63, %v801_v59  ;;  %v3151_v59 = vperm.slane %v2615_v12, 6 }
 0x15f   : > { %v2735_v32 = vadd.f32 %v896_v18, %v884_v1  ;;  %v2746_v56 = vadd.f32 %v993_v21, %v981_v4  ;;  %v842_v18 = vperm.slane %v2615_v12, 5 }
 0x160   : > { %v764_v37 = vpop.permute.xlu1 %763  ;;  %v2760_v4 = vadd.f32 %v844_v31, %v832_v22 }
 0x161   : > { %v2667_v27 = vpop.permute.xlu0 %782  ;;  %v776_v36 = vsel %vm773_vm0, %v2613_v11, %v764_v37  ;;  %v894_v11 = vperm.slane %v2615_v12, 2 }
 0x162   : > { %v865_v21 = vmul.f32 %v3142_v3, %v776_v36 }
 0x168   : > { %v795_v17 = vpop.permute.xlu1 %794 }
 0x169   : > { %v768_v25 = vpop.permute.xlu0 %767  ;;  %v799_v30 = vsel %vm798_vm1, %v791_v40, %v795_v17 }
 0x16a   : > { %v774_v54 = vsel %vm773_vm0, %v764_v37, %v768_v25  ;;  %v780_v1 = vsel %vm773_vm0, %v768_v25, %v2603_v5  ;;  %v813_v37 = vmul.f32 %v3150_v2, %v776_v36  ;;  %v962_v5 = vmul.f32 %v3149_v13, %v776_v36  ;;  %v2062_v13 = vld [vmem:[#allocation7 + $0x38] ss:$0 sm:$0xff] }
 0x16b   : > { %v811_v63 = vmul.f32 %v3145_v20, %v780_v1  ;;  %v814_v40 = vmul.f32 %v3143_v23, %v774_v54  ;;  %v863_v22 = vmul.f32 %v3144_v24, %v780_v1  ;;  %v897_v44 = vmul.f32 %v3147_v19, %v799_v30 }
 0x16c   : > { %v866_v3 = vmul.f32 %v3146_v38, %v774_v54  ;;  %v960_v36 = vmul.f32 %v3148_v48, %v780_v1  ;;  %v803_v23 = vsel %vm798_vm1, %v2667_v27, %v2605_v6  ;;  %v994_v24 = vmul.f32 %v2755_v34, %v799_v30  ;;  %v2797_v48 = vld [vmem:[#allocation7 + $0x20] ss:$0 sm:$0xff] }
 0x16d   : > { %v963_v31 = vmul.f32 %v3151_v59, %v774_v54  ;;  %v2792_v20 = vshrl.u32 %v771_v7, 7  ;;  %v833_v38 = vadd.f32 %v2652_v39, %v813_v37  ;;  %v885_v19 = vadd.f32 %v2655_v41, %v865_v21 }
 0x16e   : > { %v982_v1 = vadd.f32 %v2658_v26, %v962_v5  ;;  %v805_v6 = vsel %vm798_vm1, %v795_v17, %v2667_v27  ;;  %v845_v54 = vmul.f32 %v841_v0, %v799_v30  ;;  %v831_v7 = vadd.f32 %v2634_v28, %v811_v63  ;;  %v797_v17 = vpop.permute.xlu2 %796 }
 0x16f   : > { %v834_v59 = vadd.f32 %v2661_v42, %v814_v40  ;;  %v883_v39 = vadd.f32 %v2637_v29, %v863_v22  ;;  %v843_v41 = vmul.f32 %v3153_v14, %v803_v23  ;;  %v2809_v26 = vadd.f32 %v897_v44, %v885_v19  ;;  %v1945_v19 = vld [vmem:[#allocation10 + $0xb8] sm:$0xff] }
 0x170   : > { %v2782_v25 = vpop.permute.xlu1 %784  ;;  %v886_v37 = vadd.f32 %v2664_v43, %v866_v3  ;;  %v980_v21 = vadd.f32 %v2643_v33, %v960_v36  ;;  %v895_v27 = vmul.f32 %v3152_v16, %v803_v23  ;;  %v846_v28 = vmul.f32 %v842_v18, %v805_v6  ;;  %v1929_v43 = vld [vmem:[#allocation10 + $0x38] sm:$0xff]  ;;  %1433 = vmatpush.bf16.msrb.mxu2 %v1945_v19 }
 0x171   : > { %v762_v2 = vpop.permute.xlu0 %761  ;;  %v2817_v30 = vadd.f32 %v994_v24, %v982_v1  ;;  %v983_v29 = vadd.f32 %v2670_v45, %v963_v31  ;;  %v992_v42 = vmul.f32 %v2797_v48, %v803_v23  ;;  %v898_v44 = vmul.f32 %v894_v11, %v805_v6  ;;  %v1937_v3 = vld [vmem:[#allocation10 + $0x78] sm:$0xff]  ;;  %1405 = vmatpush.bf16.msrb.mxu0 %v1929_v43 }
 0x172   : > { %v995_v63 = vmul.f32 %v2062_v13, %v805_v6  ;;  %v806_v33 = vsel %vm798_vm1, %v797_v17, %v2782_v25  ;;  %v2826_v5 = vadd.f32 %v845_v54, %v833_v38  ;;  %v2828_v40 = vadd.f32 %v843_v41, %v831_v7  ;;  %v1953_v23 = vld [vmem:[#allocation10 + $0xf8] sm:$0xff]  ;;  %1419 = vmatpush.bf16.msrb.mxu1 %v1937_v3  ;;  %v1936_v41 = vld [vmem:[#allocation10 + $0x70] sm:$0xff] }
 0x173   : > { %v2830_v24 = vadd.f32 %v846_v28, %v834_v59  ;;  %v2832_v45 = vadd.f32 %v895_v27, %v883_v39  ;;  %v2835_v31 = vadd.f32 %v898_v44, %v886_v37  ;;  %v2837_v36 = vadd.f32 %v992_v42, %v980_v21  ;;  %1447 = vmatpush.bf16.msrb.mxu3 %v1953_v23  ;;  %v1928_v39 = vld [vmem:[#allocation10 + $0x30] sm:$0xff]  ;;  %v2874_v16 = vld [vmem:[#allocation8] sm:$0xf] }
 0x174   : > { %v779_v1 = vsel %vm773_vm0, %v2737_v35, %v762_v2  ;;  %v2843_v59 = vadd.f32 %v995_v63, %v983_v29  ;;  %v2847_v54 = vmul.f32 %v842_v18, %v806_v33  ;;  %v1944_v37 = vld [vmem:[#allocation10 + $0xb0] sm:$0xff]  ;;  %v2853_v21 = vmul.f32 %v894_v11, %v806_v33 }
 0x175   : > { %v3167_v27 = vperm.slane %v2611_v10, 3  ;;  %v3168_v29 = vperm.slane %v2611_v10, 0  ;;  %v3169_v18 = vperm.slane %v2611_v10, 6  ;;  %v3170_v43 = vperm.slane %v2609_v9, 3  ;;  %1406 = vmatpush.bf16.msrb.mxu0 %v1928_v39  ;;  %1434 = vmatpush.bf16.msrb.mxu2 %v1944_v37 }
 0x176   : > { %v3171_v19 = vperm.slane %v2609_v9, 0  ;;  %v3172_v11 = vperm.slane %v2609_v9, 6  ;;  %v2877_v14 = vmul.f32 %v2062_v13, %v806_v33  ;;  %1420 = vmatpush.bf16.msrb.mxu1 %v1936_v41  ;;  %v1011_v39 = vrot.slane %v2843_v59, 1  ;;  %v1951_v33 = vld [vmem:[#allocation10 + $0xe8] sm:$0xff]  ;;  %v1942_v41 = vld [vmem:[#allocation10 + $0xa0] sm:$0xff] }
 0x177   : > { %v816_v3 = vmul.f32 %v3170_v43, %v779_v1  ;;  %v1927_v43 = vld [vmem:[#allocation10 + $0x28] sm:$0xff]  ;;  %vm921_vm2 = vcmp.lt.s32.totalorder %v2792_v20, 1  ;;  %vm1016_vm3 = vcmp.lt.s32.totalorder %v2792_v20, 7  ;;  %v1056_v59 = vperm.slane %v2874_v16, 3 }
 0x178   : > { %v766_v6 = vpop.permute.xlu1 %765  ;;  %v868_v23 = vmul.f32 %v3171_v19, %v779_v1  ;;  %v965_v38 = vmul.f32 %v3172_v11, %v779_v1  ;;  %v911_v19 = vrot.slane %v2832_v45, 7  ;;  %v3173_v1 = vperm.slane %v2611_v10, 2 }
 0x179   : > { %v777_v7 = vsel %vm773_vm0, %v762_v2, %v766_v6  ;;  %v793_v63 = vpop.permute.xlu0 %792  ;;  %v1952_v2 = vld [vmem:[#allocation10 + $0xf0] sm:$0xff]  ;;  %v836_v37 = vadd.f32 %v2682_v49, %v816_v3  ;;  %1407 = vmatpush.bf16.msrb.mxu0 %v1927_v43  ;;  %v3177_v43 = vperm.slane %v2615_v12, 0  ;;  %v3193_v20 = vperm.slane %v2874_v16, 1 }
 0x17a   : > { %v817_v28 = vmul.f32 %v3167_v27, %v777_v7  ;;  %v869_v42 = vmul.f32 %v3168_v29, %v777_v7  ;;  %v966_v44 = vmul.f32 %v3169_v18, %v777_v7  ;;  %v800_v27 = vsel %vm798_vm1, %v793_v63, %v797_v17  ;;  %1448 = vmatpush.bf16.msrb.mxu3 %v1952_v2  ;;  %v1926_v2 = vld [vmem:[#allocation10 + $0x20] sm:$0xff] }
 0x17b   : > { %v849_v18 = vmul.f32 %v841_v0, %v800_v27  ;;  %v901_v17 = vmul.f32 %v3173_v1, %v800_v27  ;;  %v1008_v0 = vrot.slane %v2837_v36, 1  ;;  %v985_v11 = vadd.f32 %v2693_v52, %v965_v38 }
 0x17c   : > { %v837_v22 = vadd.f32 %v2696_v53, %v817_v28  ;;  %v889_v29 = vadd.f32 %v2700_v57, %v869_v42  ;;  %v986_v7 = vadd.f32 %v2703_v55, %v966_v44  ;;  %v998_v53 = vmul.f32 %v2755_v34, %v800_v27  ;;  %v1935_v57 = vld [vmem:[#allocation10 + $0x68] sm:$0xff] }
 0x17d   : > { %v1943_v55 = vld [vmem:[#allocation10 + $0xa8] sm:$0xff]  ;;  %v914_v28 = vrot.slane %v2835_v31, 7  ;;  %v888_v44 = vadd.f32 %v2690_v51, %v868_v23  ;;  %1421 = vmatpush.bf16.msrb.mxu1 %v1935_v57  ;;  %v1934_v51 = vld [vmem:[#allocation10 + $0x60] sm:$0xff]  ;;  %v3174_v52 = vperm.slane %v2607_v8, 3  ;;  %v3175_v38 = vperm.slane %v2615_v12, 3  ;;  %1408 = vmatpush.bf16.msrb.mxu0 %v1926_v2 }
 0x17e   : > { %v2887_v10 = vadd.f32 %v901_v17, %v889_v29  ;;  %v2889_v42 = vadd.f32 %v998_v53, %v986_v7  ;;  %v2896_v27 = vadd.f32 %v849_v18, %v837_v22  ;;  %1435 = vmatpush.bf16.msrb.mxu2 %v1943_v55  ;;  %v3176_v23 = vperm.slane %v2607_v8, 0  ;;  %1449 = vmatpush.bf16.msrb.mxu3 %v1951_v33 }
 0x17f   : > { %v3179_v55 = vperm.slane %v2615_v12, 6 }
 0x180   : > { %v770_v1 = vpop.permute.xlu1 %769  ;;  %v917_v29 = vrot.slane %v2887_v10, 7  ;;  %v1014_v7 = vrot.slane %v2889_v42, 1 }
 0x181   : > { %v775_v17 = vsel %vm773_vm0, %v766_v6, %v770_v1  ;;  %v781_v49 = vsel %vm773_vm0, %v770_v1, %v2737_v35  ;;  %v789_v6 = vpop.permute.xlu0 %788  ;;  %v3178_v35 = vperm.slane %v2607_v8, 6  ;;  %1422 = vmatpush.bf16.msrb.mxu1 %v1934_v51 }
 0x182   : > { %v815_v22 = vmul.f32 %v3174_v52, %v781_v49  ;;  %v818_v3 = vmul.f32 %v3175_v38, %v775_v17  ;;  %v867_v18 = vmul.f32 %v3176_v23, %v781_v49  ;;  %v870_v53 = vmul.f32 %v3177_v43, %v775_v17  ;;  %v1950_v23 = vld [vmem:[#allocation10 + $0xe0] sm:$0xff]  ;;  %1436 = vmatpush.bf16.msrb.mxu2 %v1942_v41 }
 0x183   : > { %v964_v57 = vmul.f32 %v3178_v35, %v781_v49  ;;  %v967_v1 = vmul.f32 %v3179_v55, %v775_v17  ;;  %v802_v52 = vsel %vm798_vm1, %v789_v6, %v793_v63  ;;  %v804_v38 = vsel %vm798_vm1, %v2782_v25, %v789_v6  ;;  %v1925_v49 = vld [vmem:[#allocation10 + $0x18] sm:$0xff]  ;;  %1450 = vmatpush.bf16.msrb.mxu3 %v1950_v23  ;;  %v1924_v55 = vld [vmem:[#allocation10 + $0x10] sm:$0xff] }
 0x184   : > { %v835_v34 = vadd.f32 %v2673_v46, %v815_v22  ;;  %v838_v43 = vadd.f32 %v2706_v58, %v818_v3  ;;  %v887_v33 = vadd.f32 %v2676_v47, %v867_v18  ;;  %v890_v13 = vadd.f32 %v2716_v62, %v870_v53  ;;  %v1933_v46 = vld [vmem:[#allocation10 + $0x58] sm:$0xff]  ;;  %1409 = vmatpush.bf16.msrb.mxu0 %v1925_v49 }
 0x185   : > { %v984_v12 = vadd.f32 %v2685_v50, %v964_v57  ;;  %v987_v17 = vadd.f32 %v2719_v60, %v967_v1  ;;  %v3180_v63 = vperm.slane %v2607_v8, 5  ;;  %v848_v25 = vmul.f32 %v3181_v15, %v802_v52  ;;  %v1941_v60 = vld [vmem:[#allocation10 + $0x98] sm:$0xff]  ;;  %v938_v57 = vpop.permute.xlu2 %937  ;;  %1423 = vmatpush.bf16.msrb.mxu1 %v1933_v46 }
 0x186   : > { %v910_v58 = vadd.f32 %v2853_v21, %v890_v13  ;;  %v3182_v47 = vperm.slane %v2607_v8, 2  ;;  %v3183_v62 = vperm.slane %v2609_v9, 2  ;;  %v996_v50 = vmul.f32 %v2797_v48, %v804_v38  ;;  %v1949_v21 = vld [vmem:[#allocation10 + $0xd8] sm:$0xff]  ;;  %1437 = vmatpush.bf16.msrb.mxu2 %v1941_v60  ;;  %v1939_v60 = vld [vmem:[#allocation10 + $0x88] sm:$0xff] }
 0x187   : > { %v847_v35 = vmul.f32 %v3180_v63, %v804_v38  ;;  %v2940_v3 = vadd.f32 %v2877_v14, %v987_v17  ;;  %v856_v51 = vadd.f32 %v848_v25, %v836_v37  ;;  %v997_v53 = vmul.f32 %v2708_v61, %v802_v52  ;;  %v1932_v37 = vld [vmem:[#allocation10 + $0x50] sm:$0xff]  ;;  %1451 = vmatpush.bf16.msrb.mxu3 %v1949_v21  ;;  %v1923_v25 = vld [vmem:[#allocation10 + $0x8] sm:$0xff] }
 0x188   : > { %v899_v22 = vmul.f32 %v3182_v47, %v804_v38  ;;  %v900_v2 = vmul.f32 %v3183_v62, %v802_v52  ;;  %v918_v8 = vrot.slane %v910_v58, 7  ;;  %v2943_v9 = vadd.f32 %v996_v50, %v984_v12  ;;  %v933_v48 = vpop.permute.xlu1 %932  ;;  %v1948_v17 = vld [vmem:[#allocation10 + $0xd0] sm:$0xff]  ;;  %1410 = vmatpush.bf16.msrb.mxu0 %v1924_v55  ;;  %v1931_v62 = vld [vmem:[#allocation10 + $0x48] sm:$0xff] }
 0x189   : > { %v855_v18 = vadd.f32 %v847_v35, %v835_v34  ;;  %v1015_v41 = vrot.slane %v2940_v3, 1  ;;  %v2946_v1 = vadd.f32 %v997_v53, %v985_v11  ;;  %v858_v14 = vadd.f32 %v2847_v54, %v838_v43  ;;  %v1940_v54 = vld [vmem:[#allocation10 + $0x90] sm:$0xff]  ;;  %1424 = vmatpush.bf16.msrb.mxu1 %v1932_v37  ;;  %v1028_v50 = vpop.permute.xlu0 %1027  ;;  %v1938_v37 = vld [vmem:[#allocation10 + $0x80] sm:$0xff] }
 0x18a   : > { %v907_v13 = vadd.f32 %v899_v22, %v887_v33  ;;  %v908_v6 = vadd.f32 %v900_v2, %v888_v44  ;;  %v3184_v61 = vrot.slane %v2809_v26, 7  ;;  %v1012_v38 = vrot.slane %v2943_v9, 1  ;;  %1438 = vmatpush.bf16.msrb.mxu2 %v1940_v54 }
 0x18b   : > { %v925_v11 = vsel %vm921_vm2, %v914_v28, %v918_v8  ;;  %v1013_v23 = vrot.slane %v2946_v1, 1  ;;  %v3186_v63 = vrot.slane %v2735_v32, 7  ;;  %v929_v45 = vsel %vm921_vm2, %v918_v8, %v914_v28  ;;  %1452 = vmatpush.bf16.msrb.mxu3 %v1948_v17  ;;  %v1930_v1 = vld [vmem:[#allocation10 + $0x40] sm:$0xff] }
 0x18c   : > { %v924_v34 = vsel %vm921_vm2, %v3184_v61, %v917_v29  ;;  %v915_v44 = vrot.slane %v907_v13, 7  ;;  %v916_v52 = vrot.slane %v908_v6, 7  ;;  %v947_v33 = vmul.f32 %v938_v57, %v925_v11  ;;  %v1947_v6 = vld [vmem:[#allocation10 + $0xc8] sm:$0xff]  ;;  %1411 = vmatpush.bf16.msrb.mxu0 %v1923_v25 }
 0x18d   : > { %v946_v43 = vmul.f32 %v938_v57, %v924_v34  ;;  %v3185_v49 = vmov %v3184_v61  ;;  %v3187_v10 = vmov %v3186_v63  ;;  %v943_v13 = vmul.f32 %v933_v48, %v929_v45  ;;  %1425 = vmatpush.bf16.msrb.mxu1 %v1931_v62 }
 0x18e   : > { %v928_v12 = vsel %vm921_vm2, %v917_v29, %v3185_v49  ;;  %v923_v35 = vsel %vm921_vm2, %v3186_v63, %v916_v52  ;;  %v922_v15 = vsel %vm921_vm2, %v911_v19, %v915_v44  ;;  %v926_v26 = vsel %vm921_vm2, %v915_v44, %v911_v19  ;;  %1439 = vmatpush.bf16.msrb.mxu2 %v1939_v60 }
 0x18f   : > { %v927_v29 = vsel %vm921_vm2, %v916_v52, %v3187_v10  ;;  %v944_v46 = vmul.f32 %v938_v57, %v922_v15  ;;  %v945_v58 = vmul.f32 %v938_v57, %v923_v35  ;;  %v954_v47 = vadd.f32 %v946_v43, %v2896_v27  ;;  %1453 = vmatpush.bf16.msrb.mxu3 %v1947_v6 }
 0x190   : > { %v955_v22 = vadd.f32 %v947_v33, %v858_v14  ;;  %v940_v19 = vmul.f32 %v933_v48, %v926_v26  ;;  %v941_v2 = vmul.f32 %v933_v48, %v927_v29  ;;  %v942_v32 = vmul.f32 %v933_v48, %v928_v12  ;;  %v1033_v55 = vpop.permute.xlu1 %1032 }
 0x191   : > { %v952_v53 = vadd.f32 %v944_v46, %v855_v18  ;;  %v953_v21 = vadd.f32 %v945_v58, %v856_v51  ;;  %v1017_v27 = vsel %vm1016_vm3, %v1008_v0, %v1012_v38  ;;  %v3188_v9 = vrot.slane %v2746_v56, 1  ;;  %v1922_v51 = vld [vmem:[#allocation10] sm:$0xff]  ;;  %1426 = vmatpush.bf16.msrb.mxu1 %v1930_v1 }
 0x192   : > { %v948_v31 = vadd.f32 %v940_v19, %v2828_v40  ;;  %v949_v28 = vadd.f32 %v941_v2, %v2760_v4  ;;  %v950_v8 = vadd.f32 %v942_v32, %v2826_v5  ;;  %v951_v57 = vadd.f32 %v943_v13, %v2830_v24  ;;  %1412 = vmatpush.bf16.msrb.mxu0 %v1922_v51 }
 0x193   : > { %v1018_v18 = vsel %vm1016_vm3, %v3188_v9, %v1013_v23  ;;  %v3189_v48 = vrot.slane %v2817_v30, 1  ;;  %v1020_v4 = vsel %vm1016_vm3, %v1011_v39, %v1015_v41  ;;  %v1035_v5 = vmul.f32 %v1028_v50, %v1017_v27  ;;  %1440 = vmatpush.bf16.msrb.mxu2 %v1938_v37 }
 0x194   : > { %v1036_v14 = vmul.f32 %v1028_v50, %v1018_v18  ;;  %v1038_v61 = vmul.f32 %v1028_v50, %v1020_v4  ;;  %v1021_v34 = vsel %vm1016_vm3, %v1012_v38, %v1008_v0  ;;  %v3190_v52 = vmov %v3188_v9  ;;  %v1946_v0 = vld [vmem:[#allocation10 + $0xc0] sm:$0xff] }
 0x195   : > { %v1019_v40 = vsel %vm1016_vm3, %v3189_v48, %v1014_v7  ;;  %v1043_v44 = vadd.f32 %v1035_v5, %v948_v31  ;;  %v1022_v11 = vsel %vm1016_vm3, %v1013_v23, %v3190_v52  ;;  %v3191_v54 = vmov %v3189_v48  ;;  %1454 = vmatpush.bf16.msrb.mxu3 %v1946_v0 }
 0x196   : > { %v1037_v24 = vmul.f32 %v1028_v50, %v1019_v40  ;;  %v1023_v43 = vsel %vm1016_vm3, %v1014_v7, %v3191_v54  ;;  %v1024_v36 = vsel %vm1016_vm3, %v1015_v41, %v1011_v39  ;;  %v1044_v56 = vadd.f32 %v1036_v14, %v949_v28 }
 0x197   : > { %v1046_v33 = vadd.f32 %v1038_v61, %v951_v57  ;;  %v1039_v23 = vmul.f32 %v1033_v55, %v1021_v34  ;;  %v3192_v30 = vperm.slane %v2874_v16, 0  ;;  %v1040_v49 = vmul.f32 %v1033_v55, %v1022_v11 }
 0x198   : > { %v1045_v38 = vadd.f32 %v1037_v24, %v950_v8  ;;  %v1041_v7 = vmul.f32 %v1033_v55, %v1023_v43  ;;  %v1042_v12 = vmul.f32 %v1033_v55, %v1024_v36  ;;  %v3039_v39 = vadd.f32 %v3193_v20, %v1044_v56 }
 0x199   : > { %v3034_v42 = vadd.f32 %v3192_v30, %v1043_v44  ;;  %v1047_v3 = vadd.f32 %v1039_v23, %v952_v53  ;;  %v3194_v41 = vperm.slane %v2874_v16, 2  ;;  %v1048_v63 = vadd.f32 %v1040_v49, %v953_v21 }
 0x19a   : > { %v1049_v35 = vadd.f32 %v1041_v7, %v954_v47  ;;  %v1050_v15 = vadd.f32 %v1042_v12, %v955_v22  ;;  %v3195_v26 = vmov %v3192_v30  ;;  %v1078_v25 = vmul.f32 0.044715, %v3039_v39 }
 0x19b   : > { %v3043_v17 = vadd.f32 %v3194_v41, %v1045_v38  ;;  %v1065_v10 = vadd.f32 %v3195_v26, %v1047_v3  ;;  %v1077_v29 = vmul.f32 0.044715, %v3034_v42  ;;  %v3196_v46 = vmov %v3193_v20 }
 0x19c   : > { %v1066_v58 = vadd.f32 %v3196_v46, %v1048_v63  ;;  %v3197_v62 = vmov %v3194_v41  ;;  %v1086_v47 = vmul.f32 %v1078_v25, %v3039_v39  ;;  %v3057_v22 = vadd.f32 %v1056_v59, %v1046_v33 }
 0x19d   : > { %v3053_v45 = vadd.f32 %v3197_v62, %v1049_v35  ;;  %v1081_v19 = vmul.f32 0.044715, %v1065_v10  ;;  %v1085_v2 = vmul.f32 %v1077_v29, %v3034_v42  ;;  %v3059_v32 = vadd.f32 %v1056_v59, %v1050_v15 }
 0x19e   : > { %v1082_v50 = vmul.f32 0.044715, %v1066_v58  ;;  %v1079_v60 = vmul.f32 0.044715, %v3043_v17  ;;  %v1094_v13 = vmul.f32 %v1086_v47, %v3039_v39  ;;  %v1080_v57 = vmul.f32 0.044715, %v3057_v22 }
 0x19f   : > { %v1089_v53 = vmul.f32 %v1081_v19, %v1065_v10  ;;  %v1093_v21 = vmul.f32 %v1085_v2, %v3034_v42  ;;  %v1083_v16 = vmul.f32 0.044715, %v3053_v45  ;;  %v1084_v48 = vmul.f32 0.044715, %v3059_v32 }
 0x1a0   : > { %v1090_v27 = vmul.f32 %v1082_v50, %v1066_v58  ;;  %v1087_v6 = vmul.f32 %v1079_v60, %v3043_v17  ;;  %v1102_v8 = vadd.f32 %v1094_v13, %v3039_v39  ;;  %v1088_v24 = vmul.f32 %v1080_v57, %v3057_v22 }
 0x1a1   : > { %v1097_v31 = vmul.f32 %v1089_v53, %v1065_v10  ;;  %v1101_v28 = vadd.f32 %v1093_v21, %v3034_v42  ;;  %v1091_v9 = vmul.f32 %v1083_v16, %v3053_v45  ;;  %v1092_v61 = vmul.f32 %v1084_v48, %v3059_v32 }
 0x1a2   : > { %v1098_v18 = vmul.f32 %v1090_v27, %v1066_v58  ;;  %v1095_v51 = vmul.f32 %v1087_v6, %v3043_v17  ;;  %v1110_v5 = vmul.f32 0.7978846, %v1102_v8  ;;  %v1096_v11 = vmul.f32 %v1088_v24, %v3057_v22 }
 0x1a3   : > { %v1105_v40 = vadd.f32 %v1097_v31, %v1065_v10  ;;  %v1109_v4 = vmul.f32 0.7978846, %v1101_v28  ;;  %v1099_v55 = vmul.f32 %v1091_v9, %v3053_v45  ;;  %v1100_v43 = vmul.f32 %v1092_v61, %v3059_v32  ;;  %v2063_v28 = vld [vmem:[%s3132_s8] ss:$0 sm:$0xff] }
 0x1a4   : > { %v1106_v1 = vadd.f32 %v1098_v18, %v1066_v58  ;;  %v1103_v14 = vadd.f32 %v1095_v51, %v3043_v17  ;;  %v1104_v36 = vadd.f32 %v1096_v11, %v3057_v22  ;;  %v1069_v59 = vmul.f32 0.5, %v3034_v42 }
 0x1a5   : > { %v1113_v34 = vmul.f32 0.7978846, %v1105_v40  ;;  %2080 = vtanh.f32 %v1109_v4  ;;  %v1107_v37 = vadd.f32 %v1099_v55, %v3053_v45  ;;  %v1108_v0 = vadd.f32 %v1100_v43, %v3059_v32  ;;  %v2101_v43 = vld [vmem:[%s2504_s21 + $0x8] sm:$0xff] }
 0x1a6   : > { %v1114_v44 = vmul.f32 0.7978846, %v1106_v1  ;;  %2082 = vtanh.f32 %v1110_v5  ;;  %v1111_v52 = vmul.f32 0.7978846, %v1103_v14  ;;  %v1112_v56 = vmul.f32 0.7978846, %v1104_v36 }
 0x1a7   : > { %2084 = vtanh.f32 %v1113_v34  ;;  %v1115_v54 = vmul.f32 0.7978846, %v1107_v37  ;;  %v1116_v33 = vmul.f32 0.7978846, %v1108_v0  ;;  %v1073_v20 = vmul.f32 0.5, %v1065_v10  ;;  %v2100_v5 = vld [vmem:[%s2504_s21] sm:$0xff] }
 0x1a8   : > { %2086 = vtanh.f32 %v1114_v44  ;;  %v1070_v63 = vmul.f32 0.5, %v3039_v39  ;;  %v1074_v35 = vmul.f32 0.5, %v1066_v58  ;;  %v1071_v46 = vmul.f32 0.5, %v3043_v17 }
 0x1a9   : > { %2088 = vtanh.f32 %v1111_v52  ;;  %v1075_v47 = vmul.f32 0.5, %v3053_v45  ;;  %v1072_v58 = vmul.f32 0.5, %v3057_v22  ;;  %v1076_v16 = vmul.f32 0.5, %v3059_v32 }
 0x1aa   : > { %2090 = vtanh.f32 %v1115_v54 }
 0x1ab   : > { %v2081_v38 = vpop.eup %2080  ;;  %2092 = vtanh.f32 %v1112_v56 }
 0x1ac   : > { %v2083_v23 = vpop.eup %2082  ;;  %v1125_v30 = vadd.f32 1.0, %v2081_v38  ;;  %2094 = vtanh.f32 %v1116_v33 }
 0x1ad   : > { %v2085_v49 = vpop.eup %2084  ;;  %v1126_v7 = vadd.f32 1.0, %v2083_v23 }
 0x1ae   : > { %v2087_v12 = vpop.eup %2086  ;;  %v1129_v3 = vadd.f32 1.0, %v2085_v49  ;;  %v1133_v29 = vmul.f32 %v1125_v30, %v1069_v59 }
 0x1af   : > { %v2089_v41 = vpop.eup %2088  ;;  %v1130_v15 = vadd.f32 1.0, %v2087_v12  ;;  %v1134_v19 = vmul.f32 %v1126_v7, %v1070_v63 }
 0x1b0   : > { %v2091_v26 = vpop.eup %2090  ;;  %v1137_v25 = vmul.f32 %v1129_v3, %v1073_v20  ;;  %v1127_v62 = vadd.f32 1.0, %v2089_v41 }
 0x1b1   : > { %v1138_v2 = vmul.f32 %v1130_v15, %v1074_v35  ;;  %v1131_v50 = vadd.f32 1.0, %v2091_v26  ;;  %v2093_v60 = vpop.eup %2092 }
 0x1b2   : > { %v1141_v42 = vpack.c.bf16 %v1137_v25, %v1133_v29  ;;  %v2095_v10 = vpop.eup %2094  ;;  %v1135_v21 = vmul.f32 %v1127_v62, %v1071_v46  ;;  %v1128_v39 = vadd.f32 1.0, %v2093_v60 }
 0x1b3   : > { %v1142_v53 = vpack.c.bf16 %v1138_v2, %v1134_v19  ;;  %v1139_v13 = vmul.f32 %v1131_v50, %v1075_v47  ;;  %v1132_v27 = vadd.f32 1.0, %v2095_v10 }
 0x1b4   : > { %1413 = vmatmul.bf16.vlgmr.msrb.gmra.mxu0 %v1141_v42  ;;  %v1136_v6 = vmul.f32 %v1128_v39, %v1072_v58 }
 0x1b5   : > { %1427 = vmatmul.bf16.vlgmr.msrb.gmra.mxu1 %v1142_v53  ;;  %v1143_v17 = vpack.c.bf16 %v1139_v13, %v1135_v21  ;;  %v1140_v31 = vmul.f32 %v1132_v27, %v1076_v16 }
 0x1b7   : > { %1441 = vmatmul.bf16.vlgmr.msrb.gmra.mxu2 %v1143_v17  ;;  %v1144_v45 = vpack.c.bf16 %v1140_v31, %v1136_v6 }
 0x1b9   : > { %1455 = vmatmul.bf16.vlgmr.msrb.gmra.mxu3 %v1144_v45 }
 0x231   : > { %v1414_v8 = vpop.f32.mrf.mxu0 }
 0x232   : > { %v1415_v9 = vadd.f32 %v2063_v28, %v1414_v8  ;;  %v1428_v18 = vpop.f32.mrf.mxu1 }
 0x234   : > { %v1429_v51 = vadd.f32 %v1428_v18, %v1415_v9 }
 0x239   : > { %v1416_v57 = vpop.f32.mrf.mxu0 }
 0x23a   : > { %v1442_v22 = vpop.f32.mrf.mxu2  ;;  %v1417_v40 = vadd.f32 %v2063_v28, %v1416_v57  ;;  %v1430_v1 = vpop.f32.mrf.mxu1 }
 0x23b   : > { %v1443_v32 = vadd.f32 %v1442_v22, %v1429_v51 }
 0x23c   : > { %v1456_v48 = vpop.f32.mrf.mxu3  ;;  %v1431_v14 = vadd.f32 %v1430_v1, %v1417_v40 }
 0x23d   : > { %v1457_v4 = vadd.f32 %v1456_v48, %v1443_v32 }
 0x23f   : > { %v1461_v55 = vadd.f32 %v2100_v5, %v1457_v4 }
 0x241   : > { %v1465_v24 = vmul.f32 0.044715, %v1461_v55  ;;  %v1463_v7 = vmul.f32 0.5, %v1461_v55 }
 0x242   : > { %v1444_v61 = vpop.f32.mrf.mxu2 }
 0x243   : > { %v1445_v34 = vadd.f32 %v1444_v61, %v1431_v14  ;;  %v1467_v37 = vmul.f32 %v1465_v24, %v1461_v55 }
 0x244   : > { %v1458_v44 = vpop.f32.mrf.mxu3 }
 0x245   : > { %v1469_v52 = vmul.f32 %v1467_v37, %v1461_v55  ;;  %v1459_v11 = vadd.f32 %v1458_v44, %v1445_v34 }
 0x247   : > { %v1471_v54 = vadd.f32 %v1469_v52, %v1461_v55  ;;  %v1462_v36 = vadd.f32 %v2101_v43, %v1459_v11 }
 0x249   : > { %v1473_v0 = vmul.f32 0.7978846, %v1471_v54  ;;  %v1466_v56 = vmul.f32 0.044715, %v1462_v36  ;;  %v1464_v3 = vmul.f32 0.5, %v1462_v36 }
 0x24b   : > { %2096 = vtanh.f32 %v1473_v0  ;;  %v1468_v38 = vmul.f32 %v1466_v56, %v1462_v36 }
 0x24d   : > { %v1470_v33 = vmul.f32 %v1468_v38, %v1462_v36 }
 0x24f   : > { %v1472_v23 = vadd.f32 %v1470_v33, %v1462_v36 }
 0x251   : > { %v2097_v30 = vpop.eup %2096  ;;  %v1474_v49 = vmul.f32 0.7978846, %v1472_v23 }
 0x252   : > { %v1477_v12 = vadd.f32 1.0, %v2097_v30 }
 0x253   : > { %2098 = vtanh.f32 %v1474_v49 }
 0x254   : > { %v1479_v59 = vmul.f32 %v1477_v12, %v1463_v7 }
 0x256   : > { %1481 = vst [vmem:[%s404_s15] sm:$0xff] %v1479_v59 }
 0x259   : > { %v2099_v20 = vpop.eup %2098 }
 0x25a   : > { %v1478_v41 = vadd.f32 1.0, %v2099_v20 }
 0x25c   : > { %v1480_v63 = vmul.f32 %v1478_v41, %v1464_v3 }
 0x25e   : > { %1482 = vst [vmem:[%s404_s15 + $0x8] sm:$0xff] %v1480_v63 }
 0x25f   : > { %2279 = shalt.err (!%p2276_p8)
}
 0x260   : > { %s2342_s2 = smov 128   ;;  %s2343_s4 = smov 8  }
 0x261   : > { %1975 = dma.vmem_to_hbm [thread:$0]  (%p2432_p5), %s1497_s22, 256, %s1499_s28, %s1484_s16, %s2342_s2, %s2342_s2, %s2343_s4  }
 0x262 PF: > { %p2007_p9 = scmp.ge.s32.totalorder %s2326_s12, 2  ;;  %s1513_s27 = sand.u32 1, %s2314_s30  }
 0x263   : > { %s1514_s1 = scalar_lea.sflag [#allocation4], %s1513_s27 }
 0x264   : > { %p1994_p10 = pnand %p2007_p9, %p2436_p6 }
 0x266   : > { %p1995_p11 = pneg %p1994_p10 }
 0x268   : > { %2309 = dma.done.wait (%p1995_p11), %s1514_s1, 256  }
 0x269   : > { %2311 = vsyncadd (%p1995_p11), %s1514_s1, 4294967040  ;;  %s3198_s12 = sld [smem:[#allocation17_spill]]  ;;  %s3201_s30 = smov %s2318_s10 }
 0x26a   : > { %s3199_s11 = sld [smem:[#allocation16_spill]] }
 0x26b   : > { %s3200_s15 = sld [smem:[#allocation18_spill]] }
 0x26f   : > { %p22_p12 = scmp.ge.s32.totalorder %s3198_s12, 4  }
 0x270   : > { %s3202_s10 = smov %s3199_s11 }
 0x271   : > { %s3203_s11 = smov %s3200_s15  ;;  %24 = sbr.rel (!%p22_p12) target bundleno = 10 (0xa), region = 112 }
 0x276   :  { %1520 = vsyncpa [#allocation3], 1 }
 0x277   :  { %1522 = vsyncpa [#allocation3 + $0x1], 1 }
 0x278   :  { %1523 = vsyncpa [#allocation6], 1 }
 0x279   :  { %1524 = vsyncpa [#allocation9], 1 }
 0x27a   :  { %1525 = vsyncpa [#allocation4], 1 }
 0x27b   :  { %1527 = vsyncpa [#allocation4 + $0x1], 1 }

</bundles_post_ra>
